<compile_context>
chip_gen: v5e
topology: v5e:2x2
jax: 0.10.0
libtpu: 0.0.40
codegen_flags: <defaults>
</compile_context>

<pallas_src>
import functools
import math

import jax
import jax.numpy as jnp
from jax.experimental import pallas as pl
from jax.experimental.pallas import tpu as pltpu

_LANE = 128
_BC_BLK = 128       # lane-aligned block reserved for each of B and C in the fused projection
_SCAN_UNROLL = 4


def _round_up(x, m):
    return ((x + m - 1) // m) * m


def _silu(x):
    # x * sigmoid(x), with the reciprocal on the EUP (approx is well within tolerance)
    return x * pl.reciprocal(1.0 + jnp.exp(-x), approx=True)


def _softplus(x):
    # matches torch.nn.functional.softplus (threshold=20)
    return jnp.where(x > 20.0, x, jnp.log(1.0 + jnp.exp(jnp.minimum(x, 20.0))))


def block_kernel(
    hs_ref,         # (1, Lc, Dp)            hidden_states chunk
    res_ref,        # (1, Lc, Dp)            residual chunk
    ln_w_ref,       # (1, Dp)
    ln_b_ref,       # (1, Dp)
    in_w_ref,       # (Dp, 2*dip)   bf16     in_proj weight, (in, out) = [x | z]
    conv_w_ref,     # (d_conv, dip)          depthwise conv taps (tap, channel)
    conv_b_ref,     # (1, dip)
    xdt_w_ref,      # (dip, dip+2*_BC_BLK) bf16  fused x_proj+dt_proj, (in, out) = [dt | B | C]
    dt_b_ref,       # (1, dip)
    a_neg_ref,      # (d_state, dip)         -exp(A_log), transposed
    dskip_ref,      # (1, dip)               Mamba "D" skip parameter
    out_w_ref,      # (dip, Dp)     bf16     out_proj weight, (in, out)
    out_ref,        # (1, Lc, Dp)            mixer output chunk
    resid_out_ref,  # (1, Lc, Dp)            residual output chunk
    dt_ref,         # scratch (Lc, dip)      softplus(dt)
    dtu_ref,        # scratch (Lc, dip)      dt * conv(x)
    b_ref,          # scratch (Lc, d_state)  B rows
    c_ref,          # scratch (Lc, d_state)  C rows
    y_ref,          # scratch (Lc, dip)      scan output
    xpad_ref,       # scratch (Lc + conv_pad, dip)  padded conv input
    h_ref,          # scratch (d_state, dip)        carried SSM state
    tail_ref,       # scratch (d_conv - 1, dip)     carried conv tail
    *, eps, d_model, d_state, d_conv, d_inner_p, conv_pad,
):
    Lc = hs_ref.shape[1]
    Dp = hs_ref.shape[2]

    # First chunk of each batch row: reset the carried SSM state and conv tail.
    @pl.when(pl.program_id(1) == 0)
    def _():
        h_ref[...] = jnp.zeros_like(h_ref)
        tail_ref[...] = jnp.zeros_like(tail_ref)

    # ---- Add + LayerNorm (the "Block" part) ---------------------------------
    resid = hs_ref[0] + res_ref[0]
    resid_out_ref[0] = resid

    inv_d = 1.0 / d_model
    mean = jnp.sum(resid, axis=-1, keepdims=True) * inv_d
    centered = resid - mean
    if d_model != Dp:
        # padded lanes are zero in the input but (0 - mean) != 0 -> mask before the variance
        lane = jax.lax.broadcasted_iota(jnp.int32, (1, Dp), 1)
        centered = centered * (lane < d_model).astype(jnp.float32)
    var = jnp.sum(centered * centered, axis=-1, keepdims=True) * inv_d
    normed = centered * jax.lax.rsqrt(var + eps) * ln_w_ref[...] + ln_b_ref[...]

    # ---- in_proj: bf16 MXU, f32 accumulation, pre-transposed weight ---------
    xz = jnp.dot(normed.astype(jnp.bfloat16), in_w_ref[...],
                 preferred_element_type=jnp.float32)
    x = xz[:, :d_inner_p]
    z = xz[:, d_inner_p:]

    # ---- causal depthwise conv + SiLU ----------------------------------------
    # The main activation store lands at a sublane-aligned offset (conv_pad % 8 == 0),
    # so it is a dense store; only the (d_conv-1)-row tail write is masked.
    off = conv_pad - (d_conv - 1)
    xpad_ref[pl.ds(off, d_conv - 1), :] = tail_ref[...]        # zeros / previous chunk
    xpad_ref[pl.ds(conv_pad, Lc), :] = x
    tail_ref[...] = x[Lc - (d_conv - 1):, :]                   # carry for next chunk
    x_conv = jnp.broadcast_to(conv_b_ref[...], (Lc, d_inner_p))
    for k in range(d_conv):
        x_conv = x_conv + conv_w_ref[pl.ds(k, 1), :] * xpad_ref[pl.ds(off + k, Lc), :]
    x_conv = _silu(x_conv)

    # ---- fused x_proj + dt_proj (bf16 MXU, lane-dense output) ---------------
    xdbl = jnp.dot(x_conv.astype(jnp.bfloat16), xdt_w_ref[...],
                   preferred_element_type=jnp.float32)
    b_off = d_inner_p
    c_off = d_inner_p + _BC_BLK
    dt = _softplus(xdbl[:, :d_inner_p] + dt_b_ref[...])        # (Lc, dip)
    dt_ref[...] = dt                                           # dense stores only
    dtu_ref[...] = dt * x_conv
    b_ref[...] = xdbl[:, b_off:b_off + d_state]                # (Lc, d_state)
    c_ref[...] = xdbl[:, c_off:c_off + d_state]                # (Lc, d_state)

    # ---- selective scan: dA / dB*u formed on the fly per step ----------------
    # (no (Lc, d_state, dip) materialization; C-readout fused into the step)
    a_neg = a_neg_ref[...]                                     # (d_state, dip), loop-invariant
    eye = (jax.lax.broadcasted_iota(jnp.int32, (d_state, d_state), 0) ==
           jax.lax.broadcasted_iota(jnp.int32, (d_state, d_state), 1)).astype(jnp.float32)

    def step_group(g, h):
        base = g * _SCAN_UNROLL
        for u in range(_SCAN_UNROLL):                          # manual unroll
            t = base + u
            dt_row = dt_ref[pl.ds(t, 1), :]                    # (1, dip)
            dtu_row = dtu_ref[pl.ds(t, 1), :]                  # (1, dip)
            # B[t, :] as a (d_state, 1) column via eye-mask + lane reduce (cheap, standard)
            b_col = jnp.sum(b_ref[pl.ds(t, 1), :] * eye, axis=1, keepdims=True)
            dA_t = jnp.exp(a_neg * dt_row)                     # (d_state, dip)
            h = dA_t * h + b_col * dtu_row                     # (d_state, dip)
            y_ref[pl.ds(t, 1), :] = jnp.dot(
                c_ref[pl.ds(t, 1), :], h, preferred_element_type=jnp.float32)
        return h

    h_last = jax.lax.fori_loop(0, Lc // _SCAN_UNROLL, step_group, h_ref[...])
    h_ref[...] = h_last                                        # carry to next chunk

    # ---- skip, gate, out_proj ------------------------------------------------
    y = y_ref[...] + x_conv * dskip_ref[...]
    y = y * _silu(z)
    out_ref[0] = jnp.dot(y.astype(jnp.bfloat16), out_w_ref[...],
                         preferred_element_type=jnp.float32).astype(out_ref.dtype)


def _prepare_params(params):
    """Pack / pad / pre-transpose the PyTorch-layout params for the kernel."""
    d_inner = params["in_proj_w"].shape[0] // 2
    d_state = params["A_log"].shape[1]
    dt_rank = params["dt_proj_w"].shape[1]
    d_conv = params["conv_w"].shape[0]
    d_model = params["out_proj_w"].shape[0]
    assert d_conv >= 2 and d_state <= _BC_BLK

    Dp = _round_up(d_model, _LANE)
    dip = _round_up(d_inner, _LANE)

    def pad2(x, shape):
        x = jnp.asarray(x, jnp.float32)
        return jnp.pad(x, [(0, s - d) for d, s in zip(x.shape, shape)])

    ln_w = pad2(params["ln_w"].reshape(1, -1), (1, Dp))
    ln_b = pad2(params["ln_b"].reshape(1, -1), (1, Dp))

    w_in = jnp.asarray(params["in_proj_w"], jnp.float32)           # (2*d_inner, D)
    in_wt = jnp.concatenate(
        [pad2(w_in[:d_inner].T, (Dp, dip)), pad2(w_in[d_inner:].T, (Dp, dip))],
        axis=1).astype(jnp.bfloat16)                               # (Dp, 2*dip)

    conv_w = pad2(params["conv_w"], (d_conv, dip))
    conv_b = pad2(params["conv_b"].reshape(1, -1), (1, dip))

    xw = jnp.asarray(params["x_proj_w"], jnp.float32)              # (dt_rank+2*d_state, d_inner)
    w_dt = jnp.asarray(params["dt_proj_w"], jnp.float32) @ xw[:dt_rank]   # (d_inner, d_inner)
    w_b = xw[dt_rank:dt_rank + d_state]
    w_c = xw[dt_rank + d_state:]
    fused = jnp.zeros((dip, dip + 2 * _BC_BLK), jnp.float32)
    fused = fused.at[:d_inner, :d_inner].set(w_dt.T)
    fused = fused.at[:d_inner, dip:dip + d_state].set(w_b.T)
    fused = fused.at[:d_inner, dip + _BC_BLK:dip + _BC_BLK + d_state].set(w_c.T)
    xdt_wt = fused.astype(jnp.bfloat16)

    dt_b = pad2(params["dt_proj_b"].reshape(1, -1), (1, dip))
    a_neg = pad2((-jnp.exp(jnp.asarray(params["A_log"], jnp.float32))).T, (d_state, dip))
    dskip = pad2(params["D"].reshape(1, -1), (1, dip))
    out_wt = pad2(jnp.asarray(params["out_proj_w"], jnp.float32).T,
                  (dip, Dp)).astype(jnp.bfloat16)

    dims = dict(d_model=d_model, d_inner=d_inner, d_state=d_state,
                d_conv=d_conv, Dp=Dp, dip=dip)
    packed = (ln_w, ln_b, in_wt, conv_w, conv_b, xdt_wt, dt_b, a_neg, dskip, out_wt)
    return packed, dims


def block_forward(hidden_states, residual, params, eps=1e-5, seq_chunk=128):
    """(mixer_out, residual) = Block(hidden_states, residual) -- Add -> LN -> Mamba."""
    B, L, D = hidden_states.shape
    if residual is None:
        residual = jnp.zeros_like(hidden_states)
    assert seq_chunk % 8 == 0

    packed, dims = _prepare_params(params)
    (ln_w, ln_b, in_wt, conv_w, conv_b, xdt_wt, dt_b, a_neg, dskip, out_wt) = packed
    Dp, dip = dims["Dp"], dims["dip"]
    d_state, d_conv = dims["d_state"], dims["d_conv"]
    assert D == dims["d_model"]

    Lc = min(seq_chunk, _round_up(L, 8))       # chunk length (multiple of 8)
    assert Lc >= d_conv and Lc % _SCAN_UNROLL == 0
    Lp = _round_up(L, Lc)
    n_chunks = Lp // Lc
    conv_pad = _round_up(d_conv - 1, 8)        # aligned start for the main conv store

    hs = jnp.asarray(hidden_states, jnp.float32)
    res = jnp.asarray(residual, jnp.float32)
    if (Lp, Dp) != (L, D):
        pad = ((0, 0), (0, Lp - L), (0, Dp - D))
        hs = jnp.pad(hs, pad)
        res = jnp.pad(res, pad)

    def chunk_spec():
        return pl.BlockSpec((1, Lc, Dp), lambda b, c: (b, c, 0))

    def full_spec(shape):
        return pl.BlockSpec(shape, lambda b, c, _n=len(shape): (0,) * _n)

    grid_spec = pltpu.PrefetchScalarGridSpec(
        num_scalar_prefetch=0,
        grid=(B, n_chunks),
        in_specs=[
            chunk_spec(),                 # hidden_states
            chunk_spec(),                 # residual
            full_spec(ln_w.shape),
            full_spec(ln_b.shape),
            full_spec(in_wt.shape),
            full_spec(conv_w.shape),
            full_spec(conv_b.shape),
            full_spec(xdt_wt.shape),
            full_spec(dt_b.shape),
            full_spec(a_neg.shape),
            full_spec(dskip.shape),
            full_spec(out_wt.shape),
        ],
        out_specs=[chunk_spec(), chunk_spec()],
        scratch_shapes=[
            pltpu.VMEM((Lc, dip), jnp.float32),            # dt
            pltpu.VMEM((Lc, dip), jnp.float32),            # dt * u
            pltpu.VMEM((Lc, d_state), jnp.float32),        # B rows
            pltpu.VMEM((Lc, d_state), jnp.float32),        # C rows
            pltpu.VMEM((Lc, dip), jnp.float32),            # y
            pltpu.VMEM((Lc + conv_pad, dip), jnp.float32), # padded conv input
            pltpu.VMEM((d_state, dip), jnp.float32),       # carried SSM state h
            pltpu.VMEM((d_conv - 1, dip), jnp.float32),    # carried conv tail
        ],
    )

    kernel = functools.partial(
        block_kernel, eps=eps, d_model=D, d_state=d_state,
        d_conv=d_conv, d_inner_p=dip, conv_pad=conv_pad)

    out, resid_out = pl.pallas_call(
        kernel,
        out_shape=(
            jax.ShapeDtypeStruct((B, Lp, Dp), jnp.float32),
            jax.ShapeDtypeStruct((B, Lp, Dp), jnp.float32),
        ),
        grid_spec=grid_spec,
        compiler_params=pltpu.CompilerParams(
            dimension_semantics=("parallel", "arbitrary"),
            vmem_limit_bytes=64 * 1024 * 1024,
        ),
    )(hs, res, ln_w, ln_b, in_wt, conv_w, conv_b, xdt_wt, dt_b, a_neg, dskip, out_wt)

    return out[:, :L, :D], resid_out[:, :L, :D]


def init_params(key, d_model, d_state=16, d_conv=4, expand=2):
    d_inner = expand * d_model
    dt_rank = math.ceil(d_model / 16)
    ks = jax.random.split(key, 7)

    # dt bias init (Mamba): dt ~ exp(U*(log(dt_max)-log(dt_min)) + log(dt_min)),
    # bias = softplus^{-1}(dt)
    dt_min, dt_max = 1e-3, 0.1
    u = jax.random.uniform(ks[5], (d_inner,), jnp.float32)
    dt = jnp.exp(u * (math.log(dt_max) - math.log(dt_min)) + math.log(dt_min))
    dt = jnp.clip(dt, 1e-4)
    inv_dt = dt + jnp.log(-jnp.expm1(-dt))

    a_init = jnp.tile(
        jnp.arange(1, d_state + 1, dtype=jnp.float32)[None, :], (d_inner, 1))

    return {
        "ln_w": jnp.ones((1, d_model), jnp.float32),
        "ln_b": jnp.zeros((1, d_model), jnp.float32),
        "in_proj_w": 0.2 * jax.random.normal(ks[0], (2 * d_inner, d_model), jnp.float32),
        "conv_w": 0.3 * jax.random.normal(ks[1], (d_conv, d_inner), jnp.float32),
        "conv_b": 0.1 * jax.random.normal(ks[2], (1, d_inner), jnp.float32),
        "x_proj_w": 0.2 * jax.random.normal(ks[3], (dt_rank + 2 * d_state, d_inner), jnp.float32),
        "dt_proj_w": (dt_rank ** -0.5) * jax.random.normal(ks[4], (d_inner, dt_rank), jnp.float32),
        "dt_proj_b": inv_dt.reshape(1, d_inner),
        "A_log": jnp.log(a_init),
        "D": jnp.ones((1, d_inner), jnp.float32),
        "out_proj_w": 0.2 * jax.random.normal(ks[6], (d_model, d_inner), jnp.float32),
    }


def _reference(hs, res, p, eps=1e-5):
    """Pure-JAX f32 reference mirroring the PyTorch Block(Add->LN->Mamba) forward."""
    resid = hs + res
    mean = resid.mean(-1, keepdims=True)
    var = ((resid - mean) ** 2).mean(-1, keepdims=True)
    normed = (resid - mean) / jnp.sqrt(var + eps) * p["ln_w"][0] + p["ln_b"][0]

    d_inner = p["in_proj_w"].shape[0] // 2
    dt_rank = p["dt_proj_w"].shape[1]
    d_state = p["A_log"].shape[1]
    d_conv = p["conv_w"].shape[0]
    L = hs.shape[1]

    xz = normed @ p["in_proj_w"].T
    x, z = xz[..., :d_inner], xz[..., d_inner:]

    xp = jnp.pad(x, ((0, 0), (d_conv - 1, 0), (0, 0)))
    xc = jnp.zeros_like(x) + p["conv_b"][0]
    for k in range(d_conv):
        xc = xc + p["conv_w"][k] * xp[:, k:k + L, :]
    xc = xc * jax.nn.sigmoid(xc)

    x_dbl = xc @ p["x_proj_w"].T
    dt = x_dbl[..., :dt_rank] @ p["dt_proj_w"].T + p["dt_proj_b"][0]
    dt = jnp.where(dt > 20.0, dt, jnp.log(1.0 + jnp.exp(jnp.minimum(dt, 20.0))))
    Bm = x_dbl[..., dt_rank:dt_rank + d_state]
    Cm = x_dbl[..., dt_rank + d_state:]

    A = -jnp.exp(p["A_log"])                                   # (d_inner, d_state)
    dA = jnp.exp(dt[..., None] * A[None, None])                # (B, L, d_inner, d_state)
    dBu = (dt * xc)[..., None] * Bm[:, :, None, :]

    def scan_fn(h, inp):
        dA_t, dBu_t, C_t = inp
        h = dA_t * h + dBu_t
        return h, (h * C_t[:, None, :]).sum(-1)

    h0 = jnp.zeros((hs.shape[0], d_inner, d_state), jnp.float32)
    _, ys = jax.lax.scan(
        scan_fn, h0,
        (dA.transpose(1, 0, 2, 3), dBu.transpose(1, 0, 2, 3), Cm.transpose(1, 0, 2)))
    y = ys.transpose(1, 0, 2)
    y = y + xc * p["D"][0]
    y = y * (z * jax.nn.sigmoid(z))
    out = y @ p["out_proj_w"].T
    return out, resid


if __name__ == "__main__":
    key = jax.random.PRNGKey(0)
    k_par, k_hs, k_res = jax.random.split(key, 3)

    B, L, d_model = 2, 16, 32
    params = init_params(k_par, d_model)
    hidden_states = jax.random.normal(k_hs, (B, L, d_model), jnp.float32)
    residual = jax.random.normal(k_res, (B, L, d_model), jnp.float32)

    # seq_chunk=8 -> two L-chunks per batch row, exercising the carried SSM / conv-tail state.
    out, resid = block_forward(hidden_states, residual, params, seq_chunk=8)
    jax.block_until_ready((out, resid))

    assert out.shape == (B, L, d_model) and resid.shape == (B, L, d_model)
    out_ref, resid_ref = _reference(hidden_states, residual, params)
    assert bool(jnp.all(jnp.isfinite(out)))
    assert float(jnp.max(jnp.abs(resid - resid_ref))) < 1e-5
    rel = float(jnp.max(jnp.abs(out - out_ref)) / (jnp.max(jnp.abs(out_ref)) + 1e-6))
    assert rel < 6e-2, f"kernel/reference mismatch: rel={rel:.4f}"
    print("KERNEL_OK")
</pallas_src>

<mosaic_0001>
module attributes {stable_mosaic.version = 11 : i64} {
  func.func @block_kernel(%arg0: i32, %arg1: i32, %arg2: memref<1x8x128xf32, #tpu.memory_space<vmem>>, %arg3: memref<1x8x128xf32, #tpu.memory_space<vmem>>, %arg4: memref<1x128xf32, #tpu.memory_space<vmem>>, %arg5: memref<1x128xf32, #tpu.memory_space<vmem>>, %arg6: memref<128x256xbf16, #tpu.memory_space<vmem>>, %arg7: memref<4x128xf32, #tpu.memory_space<vmem>>, %arg8: memref<1x128xf32, #tpu.memory_space<vmem>>, %arg9: memref<128x384xbf16, #tpu.memory_space<vmem>>, %arg10: memref<1x128xf32, #tpu.memory_space<vmem>>, %arg11: memref<16x128xf32, #tpu.memory_space<vmem>>, %arg12: memref<1x128xf32, #tpu.memory_space<vmem>>, %arg13: memref<128x128xbf16, #tpu.memory_space<vmem>>, %arg14: memref<1x8x128xf32, #tpu.memory_space<vmem>>, %arg15: memref<1x8x128xf32, #tpu.memory_space<vmem>>, %arg16: memref<8x128xf32, #tpu.memory_space<vmem>>, %arg17: memref<8x128xf32, #tpu.memory_space<vmem>>, %arg18: memref<8x16xf32, #tpu.memory_space<vmem>>, %arg19: memref<8x16xf32, #tpu.memory_space<vmem>>, %arg20: memref<8x128xf32, #tpu.memory_space<vmem>>, %arg21: memref<16x128xf32, #tpu.memory_space<vmem>>, %arg22: memref<16x128xf32, #tpu.memory_space<vmem>>, %arg23: memref<3x128xf32, #tpu.memory_space<vmem>>) attributes {dimension_semantics = [#tpu.dimension_semantics<parallel>, #tpu.dimension_semantics<arbitrary>], iteration_bounds = array<i64: 2, 2>, scalar_prefetch = 0 : i64, scratch_operands = 8 : i64, tpu.core_type = #tpu.core_type<tc>, window_params = [{transform_indices = @transform_0, window_bounds = array<i64: 1, 8, 128>}, {transform_indices = @transform_1, window_bounds = array<i64: 1, 8, 128>}, {pipeline_mode = #tpu.pipeline_mode<synchronous>, transform_indices = @transform_2, window_bounds = array<i64: 1, 128>}, {pipeline_mode = #tpu.pipeline_mode<synchronous>, transform_indices = @transform_3, window_bounds = array<i64: 1, 128>}, {pipeline_mode = #tpu.pipeline_mode<synchronous>, transform_indices = @transform_4, window_bounds = array<i64: 128, 256>}, {pipeline_mode = #tpu.pipeline_mode<synchronous>, transform_indices = @transform_5, window_bounds = array<i64: 4, 128>}, {pipeline_mode = #tpu.pipeline_mode<synchronous>, transform_indices = @transform_6, window_bounds = array<i64: 1, 128>}, {pipeline_mode = #tpu.pipeline_mode<synchronous>, transform_indices = @transform_7, window_bounds = array<i64: 128, 384>}, {pipeline_mode = #tpu.pipeline_mode<synchronous>, transform_indices = @transform_8, window_bounds = array<i64: 1, 128>}, {pipeline_mode = #tpu.pipeline_mode<synchronous>, transform_indices = @transform_9, window_bounds = array<i64: 16, 128>}, {pipeline_mode = #tpu.pipeline_mode<synchronous>, transform_indices = @transform_10, window_bounds = array<i64: 1, 128>}, {pipeline_mode = #tpu.pipeline_mode<synchronous>, transform_indices = @transform_11, window_bounds = array<i64: 128, 128>}, {transform_indices = @transform_12, window_bounds = array<i64: 1, 8, 128>}, {transform_indices = @transform_13, window_bounds = array<i64: 1, 8, 128>}]} {
    %c0_i32 = arith.constant 0 : i32
    %0 = arith.cmpi eq, %arg1, %c0_i32 : i32
    %1 = arith.extui %0 : i1 to i32
    %c0_i32_0 = arith.constant 0 : i32
    %2 = arith.cmpi ne, %1, %c0_i32_0 : i32
    scf.if %2 {
      %cst_77 = arith.constant 0.000000e+00 : f32
      %132 = vector.broadcast %cst_77 : f32 to vector<16x128xf32>
      %c0_78 = arith.constant 0 : index
      %c0_79 = arith.constant 0 : index
      %133 = vector.load %arg22[%c0_78, %c0_79] : memref<16x128xf32, #tpu.memory_space<vmem>>, vector<16x128xf32>
      tpu.vector_store %arg22[%c0_78, %c0_79], %132 {strides = array<i32>} : memref<16x128xf32, #tpu.memory_space<vmem>>, vector<16x128xf32>,
      %cst_80 = arith.constant 0.000000e+00 : f32
      %134 = vector.broadcast %cst_80 : f32 to vector<3x128xf32>
      %c0_81 = arith.constant 0 : index
      %c0_82 = arith.constant 0 : index
      %135 = vector.load %arg23[%c0_81, %c0_82] : memref<3x128xf32, #tpu.memory_space<vmem>>, vector<3x128xf32>
      tpu.vector_store %arg23[%c0_81, %c0_82], %134 {strides = array<i32>} : memref<3x128xf32, #tpu.memory_space<vmem>>, vector<3x128xf32>,
    } else {
    }
    %c0 = arith.constant 0 : index
    %c0_1 = arith.constant 0 : index
    %c0_2 = arith.constant 0 : index
    %3 = vector.load %arg2[%c0, %c0_1, %c0_2] : memref<1x8x128xf32, #tpu.memory_space<vmem>>, vector<1x8x128xf32>
    %4 = vector.shape_cast %3 : vector<1x8x128xf32> to vector<8x128xf32>
    %c0_3 = arith.constant 0 : index
    %c0_4 = arith.constant 0 : index
    %c0_5 = arith.constant 0 : index
    %5 = vector.load %arg3[%c0_3, %c0_4, %c0_5] : memref<1x8x128xf32, #tpu.memory_space<vmem>>, vector<1x8x128xf32>
    %6 = vector.shape_cast %5 : vector<1x8x128xf32> to vector<8x128xf32>
    %7 = arith.addf %4, %6 : vector<8x128xf32>
    %c0_6 = arith.constant 0 : index
    %c0_7 = arith.constant 0 : index
    %c0_8 = arith.constant 0 : index
    %8 = vector.load %arg15[%c0_6, %c0_7, %c0_8] : memref<1x8x128xf32, #tpu.memory_space<vmem>>, vector<1x8x128xf32>
    %9 = vector.shape_cast %8 : vector<1x8x128xf32> to vector<8x128xf32>
    %10 = vector.shape_cast %7 : vector<8x128xf32> to vector<1x8x128xf32>
    tpu.vector_store %arg15[%c0_6, %c0_7, %c0_8], %10 {strides = array<i32>} : memref<1x8x128xf32, #tpu.memory_space<vmem>>, vector<1x8x128xf32>,
    %cst = arith.constant dense<0.000000e+00> : vector<8xf32>
    %11 = vector.multi_reduction <add>, %7, %cst [1] : vector<8x128xf32> to vector<8xf32>
    %12 = vector.shape_cast %11 : vector<8xf32> to vector<8x1xf32>
    %cst_9 = arith.constant 3.125000e-02 : f32
    %13 = vector.broadcast %cst_9 : f32 to vector<8x1xf32>
    %14 = arith.mulf %12, %13 : vector<8x1xf32>
    %15 = vector.broadcast %14 : vector<8x1xf32> to vector<8x128xf32>
    %16 = arith.subf %7, %15 : vector<8x128xf32>
    %17 = tpu.iota {dimensions = array<i32: 1>} : vector<1x128xi32>
    %c32_i32 = arith.constant 32 : i32
    %18 = vector.broadcast %c32_i32 : i32 to vector<1x128xi32>
    %19 = arith.cmpi slt, %17, %18 : vector<1x128xi32>
    %20 = arith.extui %19 : vector<1x128xi1> to vector<1x128xi32>
    %21 = arith.sitofp %20 : vector<1x128xi32> to vector<1x128xf32>
    %22 = vector.broadcast %21 : vector<1x128xf32> to vector<8x128xf32>
    %23 = arith.mulf %16, %22 : vector<8x128xf32>
    %24 = arith.mulf %23, %23 : vector<8x128xf32>
    %cst_10 = arith.constant dense<0.000000e+00> : vector<8xf32>
    %25 = vector.multi_reduction <add>, %24, %cst_10 [1] : vector<8x128xf32> to vector<8xf32>
    %26 = vector.shape_cast %25 : vector<8xf32> to vector<8x1xf32>
    %cst_11 = arith.constant 3.125000e-02 : f32
    %27 = vector.broadcast %cst_11 : f32 to vector<8x1xf32>
    %28 = arith.mulf %26, %27 : vector<8x1xf32>
    %cst_12 = arith.constant 9.99999974E-6 : f32
    %29 = vector.broadcast %cst_12 : f32 to vector<8x1xf32>
    %30 = arith.addf %28, %29 : vector<8x1xf32>
    %31 = math.rsqrt %30 : vector<8x1xf32>
    %32 = vector.broadcast %31 : vector<8x1xf32> to vector<8x128xf32>
    %33 = arith.mulf %23, %32 : vector<8x128xf32>
    %c0_13 = arith.constant 0 : index
    %c0_14 = arith.constant 0 : index
    %34 = vector.load %arg4[%c0_13, %c0_14] : memref<1x128xf32, #tpu.memory_space<vmem>>, vector<1x128xf32>
    %35 = vector.broadcast %34 : vector<1x128xf32> to vector<8x128xf32>
    %36 = arith.mulf %33, %35 : vector<8x128xf32>
    %c0_15 = arith.constant 0 : index
    %c0_16 = arith.constant 0 : index
    %37 = vector.load %arg5[%c0_15, %c0_16] : memref<1x128xf32, #tpu.memory_space<vmem>>, vector<1x128xf32>
    %38 = vector.broadcast %37 : vector<1x128xf32> to vector<8x128xf32>
    %39 = arith.addf %36, %38 : vector<8x128xf32>
    %40 = arith.truncf %39 : vector<8x128xf32> to vector<8x128xbf16>
    %c0_17 = arith.constant 0 : index
    %c0_18 = arith.constant 0 : index
    %41 = vector.load %arg6[%c0_17, %c0_18] : memref<128x256xbf16, #tpu.memory_space<vmem>>, vector<128x256xbf16>
    %cst_19 = arith.constant dense<0.000000e+00> : vector<8x256xf32>
    %42 = tpu.matmul %40, %41, %cst_19 {dimension_numbers = #tpu.dot_dimension_numbers<[1], [0], [0], [1], [0, 0, 1, 1], [], []>} : vector<8x128xbf16>, vector<128x256xbf16>, vector<8x256xf32> -> vector<8x256xf32>
    %43 = vector.extract_strided_slice %42 {offsets = [0, 0], sizes = [8, 128], strides = [1, 1]} : vector<8x256xf32> to vector<8x128xf32>
    %44 = vector.extract_strided_slice %42 {offsets = [0, 128], sizes = [8, 128], strides = [1, 1]} : vector<8x256xf32> to vector<8x128xf32>
    %c0_20 = arith.constant 0 : index
    %c0_21 = arith.constant 0 : index
    %45 = vector.load %arg23[%c0_20, %c0_21] : memref<3x128xf32, #tpu.memory_space<vmem>>, vector<3x128xf32>
    %c5 = arith.constant 5 : index
    %c0_22 = arith.constant 0 : index
    %46 = vector.load %arg21[%c5, %c0_22] : memref<16x128xf32, #tpu.memory_space<vmem>>, vector<3x128xf32>
    tpu.vector_store %arg21[%c5, %c0_22], %45 {strides = array<i32>} : memref<16x128xf32, #tpu.memory_space<vmem>>, vector<3x128xf32>,
    %c8 = arith.constant 8 : index
    %c0_23 = arith.constant 0 : index
    %47 = vector.load %arg21[%c8, %c0_23] : memref<16x128xf32, #tpu.memory_space<vmem>>, vector<8x128xf32>
    tpu.vector_store %arg21[%c8, %c0_23], %43 {strides = array<i32>} : memref<16x128xf32, #tpu.memory_space<vmem>>, vector<8x128xf32>,
    %48 = vector.extract_strided_slice %43 {offsets = [5, 0], sizes = [3, 128], strides = [1, 1]} : vector<8x128xf32> to vector<3x128xf32>
    %c0_24 = arith.constant 0 : index
    %c0_25 = arith.constant 0 : index
    %49 = vector.load %arg23[%c0_24, %c0_25] : memref<3x128xf32, #tpu.memory_space<vmem>>, vector<3x128xf32>
    tpu.vector_store %arg23[%c0_24, %c0_25], %48 {strides = array<i32>} : memref<3x128xf32, #tpu.memory_space<vmem>>, vector<3x128xf32>,
    %c0_26 = arith.constant 0 : index
    %c0_27 = arith.constant 0 : index
    %50 = vector.load %arg8[%c0_26, %c0_27] : memref<1x128xf32, #tpu.memory_space<vmem>>, vector<1x128xf32>
    %51 = vector.shape_cast %50 : vector<1x128xf32> to vector<1x128xf32>
    %52 = vector.broadcast %51 : vector<1x128xf32> to vector<8x128xf32>
    %c0_28 = arith.constant 0 : index
    %c0_29 = arith.constant 0 : index
    %53 = vector.load %arg7[%c0_28, %c0_29] : memref<4x128xf32, #tpu.memory_space<vmem>>, vector<1x128xf32>
    %c5_30 = arith.constant 5 : index
    %c0_31 = arith.constant 0 : index
    %54 = vector.load %arg21[%c5_30, %c0_31] : memref<16x128xf32, #tpu.memory_space<vmem>>, vector<8x128xf32>
    %55 = vector.broadcast %53 : vector<1x128xf32> to vector<8x128xf32>
    %56 = arith.mulf %55, %54 : vector<8x128xf32>
    %57 = arith.addf %52, %56 : vector<8x128xf32>
    %c1 = arith.constant 1 : index
    %c0_32 = arith.constant 0 : index
    %58 = vector.load %arg7[%c1, %c0_32] : memref<4x128xf32, #tpu.memory_space<vmem>>, vector<1x128xf32>
    %c6 = arith.constant 6 : index
    %c0_33 = arith.constant 0 : index
    %59 = vector.load %arg21[%c6, %c0_33] : memref<16x128xf32, #tpu.memory_space<vmem>>, vector<8x128xf32>
    %60 = vector.broadcast %58 : vector<1x128xf32> to vector<8x128xf32>
    %61 = arith.mulf %60, %59 : vector<8x128xf32>
    %62 = arith.addf %57, %61 : vector<8x128xf32>
    %c2 = arith.constant 2 : index
    %c0_34 = arith.constant 0 : index
    %63 = vector.load %arg7[%c2, %c0_34] : memref<4x128xf32, #tpu.memory_space<vmem>>, vector<1x128xf32>
    %c7 = arith.constant 7 : index
    %c0_35 = arith.constant 0 : index
    %64 = vector.load %arg21[%c7, %c0_35] : memref<16x128xf32, #tpu.memory_space<vmem>>, vector<8x128xf32>
    %65 = vector.broadcast %63 : vector<1x128xf32> to vector<8x128xf32>
    %66 = arith.mulf %65, %64 : vector<8x128xf32>
    %67 = arith.addf %62, %66 : vector<8x128xf32>
    %c3 = arith.constant 3 : index
    %c0_36 = arith.constant 0 : index
    %68 = vector.load %arg7[%c3, %c0_36] : memref<4x128xf32, #tpu.memory_space<vmem>>, vector<1x128xf32>
    %c8_37 = arith.constant 8 : index
    %c0_38 = arith.constant 0 : index
    %69 = vector.load %arg21[%c8_37, %c0_38] : memref<16x128xf32, #tpu.memory_space<vmem>>, vector<8x128xf32>
    %70 = vector.broadcast %68 : vector<1x128xf32> to vector<8x128xf32>
    %71 = arith.mulf %70, %69 : vector<8x128xf32>
    %72 = arith.addf %67, %71 : vector<8x128xf32>
    %cst_39 = arith.constant 0.000000e+00 : f32
    %73 = vector.broadcast %cst_39 : f32 to vector<8x128xf32>
    %74 = arith.subf %73, %72 : vector<8x128xf32>
    %75 = math.exp %74 : vector<8x128xf32>
    %cst_40 = arith.constant 1.000000e+00 : f32
    %76 = vector.broadcast %cst_40 : f32 to vector<8x128xf32>
    %77 = arith.addf %76, %75 : vector<8x128xf32>
    %78 = tpu.reciprocal %77 {approx = true} : vector<8x128xf32> -> vector<8x128xf32>
    %79 = arith.mulf %72, %78 : vector<8x128xf32>
    %80 = arith.truncf %79 : vector<8x128xf32> to vector<8x128xbf16>
    %c0_41 = arith.constant 0 : index
    %c0_42 = arith.constant 0 : index
    %81 = vector.load %arg9[%c0_41, %c0_42] : memref<128x384xbf16, #tpu.memory_space<vmem>>, vector<128x384xbf16>
    %cst_43 = arith.constant dense<0.000000e+00> : vector<8x384xf32>
    %82 = tpu.matmul %80, %81, %cst_43 {dimension_numbers = #tpu.dot_dimension_numbers<[1], [0], [0], [1], [0, 0, 1, 1], [], []>} : vector<8x128xbf16>, vector<128x384xbf16>, vector<8x384xf32> -> vector<8x384xf32>
    %83 = vector.extract_strided_slice %82 {offsets = [0, 0], sizes = [8, 128], strides = [1, 1]} : vector<8x384xf32> to vector<8x128xf32>
    %c0_44 = arith.constant 0 : index
    %c0_45 = arith.constant 0 : index
    %84 = vector.load %arg10[%c0_44, %c0_45] : memref<1x128xf32, #tpu.memory_space<vmem>>, vector<1x128xf32>
    %85 = vector.broadcast %84 : vector<1x128xf32> to vector<8x128xf32>
    %86 = arith.addf %83, %85 : vector<8x128xf32>
    %cst_46 = arith.constant 2.000000e+01 : f32
    %87 = vector.broadcast %cst_46 : f32 to vector<8x128xf32>
    %88 = arith.cmpf ogt, %86, %87 : vector<8x128xf32>
    %cst_47 = arith.constant 2.000000e+01 : f32
    %89 = vector.broadcast %cst_47 : f32 to vector<8x128xf32>
    %90 = arith.minimumf %86, %89 : vector<8x128xf32>
    %91 = math.exp %90 : vector<8x128xf32>
    %cst_48 = arith.constant 1.000000e+00 : f32
    %92 = vector.broadcast %cst_48 : f32 to vector<8x128xf32>
    %93 = arith.addf %92, %91 : vector<8x128xf32>
    %94 = math.log %93 : vector<8x128xf32>
    %95 = arith.select %88, %86, %94 : vector<8x128xi1>, vector<8x128xf32>
    %c0_49 = arith.constant 0 : index
    %c0_50 = arith.constant 0 : index
    %96 = vector.load %arg16[%c0_49, %c0_50] : memref<8x128xf32, #tpu.memory_space<vmem>>, vector<8x128xf32>
    tpu.vector_store %arg16[%c0_49, %c0_50], %95 {strides = array<i32>} : memref<8x128xf32, #tpu.memory_space<vmem>>, vector<8x128xf32>,
    %97 = arith.mulf %95, %79 : vector<8x128xf32>
    %c0_51 = arith.constant 0 : index
    %c0_52 = arith.constant 0 : index
    %98 = vector.load %arg17[%c0_51, %c0_52] : memref<8x128xf32, #tpu.memory_space<vmem>>, vector<8x128xf32>
    tpu.vector_store %arg17[%c0_51, %c0_52], %97 {strides = array<i32>} : memref<8x128xf32, #tpu.memory_space<vmem>>, vector<8x128xf32>,
    %99 = vector.extract_strided_slice %82 {offsets = [0, 128], sizes = [8, 16], strides = [1, 1]} : vector<8x384xf32> to vector<8x16xf32>
    %c0_53 = arith.constant 0 : index
    %c0_54 = arith.constant 0 : index
    %100 = vector.load %arg18[%c0_53, %c0_54] : memref<8x16xf32, #tpu.memory_space<vmem>>, vector<8x16xf32>
    tpu.vector_store %arg18[%c0_53, %c0_54], %99 {strides = array<i32>} : memref<8x16xf32, #tpu.memory_space<vmem>>, vector<8x16xf32>,
    %101 = vector.extract_strided_slice %82 {offsets = [0, 256], sizes = [8, 16], strides = [1, 1]} : vector<8x384xf32> to vector<8x16xf32>
    %c0_55 = arith.constant 0 : index
    %c0_56 = arith.constant 0 : index
    %102 = vector.load %arg19[%c0_55, %c0_56] : memref<8x16xf32, #tpu.memory_space<vmem>>, vector<8x16xf32>
    tpu.vector_store %arg19[%c0_55, %c0_56], %101 {strides = array<i32>} : memref<8x16xf32, #tpu.memory_space<vmem>>, vector<8x16xf32>,
    %c0_57 = arith.constant 0 : index
    %c0_58 = arith.constant 0 : index
    %103 = vector.load %arg11[%c0_57, %c0_58] : memref<16x128xf32, #tpu.memory_space<vmem>>, vector<16x128xf32>
    %104 = tpu.iota {dimensions = array<i32: 0>} : vector<16x16xi32>
    %105 = tpu.iota {dimensions = array<i32: 1>} : vector<16x16xi32>
    %106 = arith.cmpi eq, %104, %105 : vector<16x16xi32>
    %107 = arith.extui %106 : vector<16x16xi1> to vector<16x16xi32>
    %108 = arith.sitofp %107 : vector<16x16xi32> to vector<16x16xf32>
    %c0_59 = arith.constant 0 : index
    %c0_60 = arith.constant 0 : index
    %109 = vector.load %arg22[%c0_59, %c0_60] : memref<16x128xf32, #tpu.memory_space<vmem>>, vector<16x128xf32>
    %c0_i32_61 = arith.constant 0 : i32
    %c2_i32 = arith.constant 2 : i32
    %110 = arith.addi %c0_i32_61, %c2_i32 : i32
    %c1_i32 = arith.constant 1 : i32
    %111 = scf.for %arg24 = %c0_i32_61 to %110 step %c1_i32 iter_args(%arg25 = %109) -> (vector<16x128xf32>)  : i32 {
      %c4_i32 = arith.constant 4 : i32
      %132 = arith.muli %arg24, %c4_i32 : i32
      %c0_i32_77 = arith.constant 0 : i32
      %133 = arith.addi %132, %c0_i32_77 : i32
      %134 = arith.index_cast %133 : i32 to index
      %c0_78 = arith.constant 0 : index
      %135 = vector.load %arg16[%134, %c0_78] : memref<8x128xf32, #tpu.memory_space<vmem>>, vector<1x128xf32>
      %136 = arith.index_cast %133 : i32 to index
      %c0_79 = arith.constant 0 : index
      %137 = vector.load %arg17[%136, %c0_79] : memref<8x128xf32, #tpu.memory_space<vmem>>, vector<1x128xf32>
      %138 = arith.index_cast %133 : i32 to index
      %c0_80 = arith.constant 0 : index
      %139 = vector.load %arg18[%138, %c0_80] : memref<8x16xf32, #tpu.memory_space<vmem>>, vector<1x16xf32>
      %140 = vector.broadcast %139 : vector<1x16xf32> to vector<16x16xf32>
      %141 = arith.mulf %140, %108 : vector<16x16xf32>
      %cst_81 = arith.constant dense<0.000000e+00> : vector<16xf32>
      %142 = vector.multi_reduction <add>, %141, %cst_81 [1] : vector<16x16xf32> to vector<16xf32>
      %143 = vector.shape_cast %142 : vector<16xf32> to vector<16x1xf32>
      %144 = vector.broadcast %135 : vector<1x128xf32> to vector<16x128xf32>
      %145 = arith.mulf %103, %144 : vector<16x128xf32>
      %146 = math.exp %145 : vector<16x128xf32>
      %147 = arith.mulf %146, %arg25 : vector<16x128xf32>
      %148 = vector.broadcast %143 : vector<16x1xf32> to vector<16x128xf32>
      %149 = vector.broadcast %137 : vector<1x128xf32> to vector<16x128xf32>
      %150 = arith.mulf %148, %149 : vector<16x128xf32>
      %151 = arith.addf %147, %150 : vector<16x128xf32>
      %152 = arith.index_cast %133 : i32 to index
      %c0_82 = arith.constant 0 : index
      %153 = vector.load %arg19[%152, %c0_82] : memref<8x16xf32, #tpu.memory_space<vmem>>, vector<1x16xf32>
      %cst_83 = arith.constant dense<0.000000e+00> : vector<1x128xf32>
      %154 = tpu.matmul %153, %151, %cst_83 {dimension_numbers = #tpu.dot_dimension_numbers<[1], [0], [0], [1], [0, 0, 1, 1], [], []>} : vector<1x16xf32>, vector<16x128xf32>, vector<1x128xf32> -> vector<1x128xf32>
      %155 = arith.index_cast %133 : i32 to index
      %c0_84 = arith.constant 0 : index
      %156 = vector.load %arg20[%155, %c0_84] : memref<8x128xf32, #tpu.memory_space<vmem>>, vector<1x128xf32>
      tpu.vector_store %arg20[%155, %c0_84], %154 {strides = array<i32>} : memref<8x128xf32, #tpu.memory_space<vmem>>, vector<1x128xf32>,
      %c1_i32_85 = arith.constant 1 : i32
      %157 = arith.addi %132, %c1_i32_85 : i32
      %158 = arith.index_cast %157 : i32 to index
      %c0_86 = arith.constant 0 : index
      %159 = vector.load %arg16[%158, %c0_86] : memref<8x128xf32, #tpu.memory_space<vmem>>, vector<1x128xf32>
      %160 = arith.index_cast %157 : i32 to index
      %c0_87 = arith.constant 0 : index
      %161 = vector.load %arg17[%160, %c0_87] : memref<8x128xf32, #tpu.memory_space<vmem>>, vector<1x128xf32>
      %162 = arith.index_cast %157 : i32 to index
      %c0_88 = arith.constant 0 : index
      %163 = vector.load %arg18[%162, %c0_88] : memref<8x16xf32, #tpu.memory_space<vmem>>, vector<1x16xf32>
      %164 = vector.broadcast %163 : vector<1x16xf32> to vector<16x16xf32>
      %165 = arith.mulf %164, %108 : vector<16x16xf32>
      %cst_89 = arith.constant dense<0.000000e+00> : vector<16xf32>
      %166 = vector.multi_reduction <add>, %165, %cst_89 [1] : vector<16x16xf32> to vector<16xf32>
      %167 = vector.shape_cast %166 : vector<16xf32> to vector<16x1xf32>
      %168 = vector.broadcast %159 : vector<1x128xf32> to vector<16x128xf32>
      %169 = arith.mulf %103, %168 : vector<16x128xf32>
      %170 = math.exp %169 : vector<16x128xf32>
      %171 = arith.mulf %170, %151 : vector<16x128xf32>
      %172 = vector.broadcast %167 : vector<16x1xf32> to vector<16x128xf32>
      %173 = vector.broadcast %161 : vector<1x128xf32> to vector<16x128xf32>
      %174 = arith.mulf %172, %173 : vector<16x128xf32>
      %175 = arith.addf %171, %174 : vector<16x128xf32>
      %176 = arith.index_cast %157 : i32 to index
      %c0_90 = arith.constant 0 : index
      %177 = vector.load %arg19[%176, %c0_90] : memref<8x16xf32, #tpu.memory_space<vmem>>, vector<1x16xf32>
      %cst_91 = arith.constant dense<0.000000e+00> : vector<1x128xf32>
      %178 = tpu.matmul %177, %175, %cst_91 {dimension_numbers = #tpu.dot_dimension_numbers<[1], [0], [0], [1], [0, 0, 1, 1], [], []>} : vector<1x16xf32>, vector<16x128xf32>, vector<1x128xf32> -> vector<1x128xf32>
      %179 = arith.index_cast %157 : i32 to index
      %c0_92 = arith.constant 0 : index
      %180 = vector.load %arg20[%179, %c0_92] : memref<8x128xf32, #tpu.memory_space<vmem>>, vector<1x128xf32>
      tpu.vector_store %arg20[%179, %c0_92], %178 {strides = array<i32>} : memref<8x128xf32, #tpu.memory_space<vmem>>, vector<1x128xf32>,
      %c2_i32_93 = arith.constant 2 : i32
      %181 = arith.addi %132, %c2_i32_93 : i32
      %182 = arith.index_cast %181 : i32 to index
      %c0_94 = arith.constant 0 : index
      %183 = vector.load %arg16[%182, %c0_94] : memref<8x128xf32, #tpu.memory_space<vmem>>, vector<1x128xf32>
      %184 = arith.index_cast %181 : i32 to index
      %c0_95 = arith.constant 0 : index
      %185 = vector.load %arg17[%184, %c0_95] : memref<8x128xf32, #tpu.memory_space<vmem>>, vector<1x128xf32>
      %186 = arith.index_cast %181 : i32 to index
      %c0_96 = arith.constant 0 : index
      %187 = vector.load %arg18[%186, %c0_96] : memref<8x16xf32, #tpu.memory_space<vmem>>, vector<1x16xf32>
      %188 = vector.broadcast %187 : vector<1x16xf32> to vector<16x16xf32>
      %189 = arith.mulf %188, %108 : vector<16x16xf32>
      %cst_97 = arith.constant dense<0.000000e+00> : vector<16xf32>
      %190 = vector.multi_reduction <add>, %189, %cst_97 [1] : vector<16x16xf32> to vector<16xf32>
      %191 = vector.shape_cast %190 : vector<16xf32> to vector<16x1xf32>
      %192 = vector.broadcast %183 : vector<1x128xf32> to vector<16x128xf32>
      %193 = arith.mulf %103, %192 : vector<16x128xf32>
      %194 = math.exp %193 : vector<16x128xf32>
      %195 = arith.mulf %194, %175 : vector<16x128xf32>
      %196 = vector.broadcast %191 : vector<16x1xf32> to vector<16x128xf32>
      %197 = vector.broadcast %185 : vector<1x128xf32> to vector<16x128xf32>
      %198 = arith.mulf %196, %197 : vector<16x128xf32>
      %199 = arith.addf %195, %198 : vector<16x128xf32>
      %200 = arith.index_cast %181 : i32 to index
      %c0_98 = arith.constant 0 : index
      %201 = vector.load %arg19[%200, %c0_98] : memref<8x16xf32, #tpu.memory_space<vmem>>, vector<1x16xf32>
      %cst_99 = arith.constant dense<0.000000e+00> : vector<1x128xf32>
      %202 = tpu.matmul %201, %199, %cst_99 {dimension_numbers = #tpu.dot_dimension_numbers<[1], [0], [0], [1], [0, 0, 1, 1], [], []>} : vector<1x16xf32>, vector<16x128xf32>, vector<1x128xf32> -> vector<1x128xf32>
      %203 = arith.index_cast %181 : i32 to index
      %c0_100 = arith.constant 0 : index
      %204 = vector.load %arg20[%203, %c0_100] : memref<8x128xf32, #tpu.memory_space<vmem>>, vector<1x128xf32>
      tpu.vector_store %arg20[%203, %c0_100], %202 {strides = array<i32>} : memref<8x128xf32, #tpu.memory_space<vmem>>, vector<1x128xf32>,
      %c3_i32 = arith.constant 3 : i32
      %205 = arith.addi %132, %c3_i32 : i32
      %206 = arith.index_cast %205 : i32 to index
      %c0_101 = arith.constant 0 : index
      %207 = vector.load %arg16[%206, %c0_101] : memref<8x128xf32, #tpu.memory_space<vmem>>, vector<1x128xf32>
      %208 = arith.index_cast %205 : i32 to index
      %c0_102 = arith.constant 0 : index
      %209 = vector.load %arg17[%208, %c0_102] : memref<8x128xf32, #tpu.memory_space<vmem>>, vector<1x128xf32>
      %210 = arith.index_cast %205 : i32 to index
      %c0_103 = arith.constant 0 : index
      %211 = vector.load %arg18[%210, %c0_103] : memref<8x16xf32, #tpu.memory_space<vmem>>, vector<1x16xf32>
      %212 = vector.broadcast %211 : vector<1x16xf32> to vector<16x16xf32>
      %213 = arith.mulf %212, %108 : vector<16x16xf32>
      %cst_104 = arith.constant dense<0.000000e+00> : vector<16xf32>
      %214 = vector.multi_reduction <add>, %213, %cst_104 [1] : vector<16x16xf32> to vector<16xf32>
      %215 = vector.shape_cast %214 : vector<16xf32> to vector<16x1xf32>
      %216 = vector.broadcast %207 : vector<1x128xf32> to vector<16x128xf32>
      %217 = arith.mulf %103, %216 : vector<16x128xf32>
      %218 = math.exp %217 : vector<16x128xf32>
      %219 = arith.mulf %218, %199 : vector<16x128xf32>
      %220 = vector.broadcast %215 : vector<16x1xf32> to vector<16x128xf32>
      %221 = vector.broadcast %209 : vector<1x128xf32> to vector<16x128xf32>
      %222 = arith.mulf %220, %221 : vector<16x128xf32>
      %223 = arith.addf %219, %222 : vector<16x128xf32>
      %224 = arith.index_cast %205 : i32 to index
      %c0_105 = arith.constant 0 : index
      %225 = vector.load %arg19[%224, %c0_105] : memref<8x16xf32, #tpu.memory_space<vmem>>, vector<1x16xf32>
      %cst_106 = arith.constant dense<0.000000e+00> : vector<1x128xf32>
      %226 = tpu.matmul %225, %223, %cst_106 {dimension_numbers = #tpu.dot_dimension_numbers<[1], [0], [0], [1], [0, 0, 1, 1], [], []>} : vector<1x16xf32>, vector<16x128xf32>, vector<1x128xf32> -> vector<1x128xf32>
      %227 = arith.index_cast %205 : i32 to index
      %c0_107 = arith.constant 0 : index
      %228 = vector.load %arg20[%227, %c0_107] : memref<8x128xf32, #tpu.memory_space<vmem>>, vector<1x128xf32>
      tpu.vector_store %arg20[%227, %c0_107], %226 {strides = array<i32>} : memref<8x128xf32, #tpu.memory_space<vmem>>, vector<1x128xf32>,
      scf.yield %223 : vector<16x128xf32>
    }
    %c2_i32_62 = arith.constant 2 : i32
    %c0_63 = arith.constant 0 : index
    %c0_64 = arith.constant 0 : index
    %112 = vector.load %arg22[%c0_63, %c0_64] : memref<16x128xf32, #tpu.memory_space<vmem>>, vector<16x128xf32>
    tpu.vector_store %arg22[%c0_63, %c0_64], %111 {strides = array<i32>} : memref<16x128xf32, #tpu.memory_space<vmem>>, vector<16x128xf32>,
    %c0_65 = arith.constant 0 : index
    %c0_66 = arith.constant 0 : index
    %113 = vector.load %arg20[%c0_65, %c0_66] : memref<8x128xf32, #tpu.memory_space<vmem>>, vector<8x128xf32>
    %c0_67 = arith.constant 0 : index
    %c0_68 = arith.constant 0 : index
    %114 = vector.load %arg12[%c0_67, %c0_68] : memref<1x128xf32, #tpu.memory_space<vmem>>, vector<1x128xf32>
    %115 = vector.broadcast %114 : vector<1x128xf32> to vector<8x128xf32>
    %116 = arith.mulf %79, %115 : vector<8x128xf32>
    %117 = arith.addf %113, %116 : vector<8x128xf32>
    %cst_69 = arith.constant 0.000000e+00 : f32
    %118 = vector.broadcast %cst_69 : f32 to vector<8x128xf32>
    %119 = arith.subf %118, %44 : vector<8x128xf32>
    %120 = math.exp %119 : vector<8x128xf32>
    %cst_70 = arith.constant 1.000000e+00 : f32
    %121 = vector.broadcast %cst_70 : f32 to vector<8x128xf32>
    %122 = arith.addf %121, %120 : vector<8x128xf32>
    %123 = tpu.reciprocal %122 {approx = true} : vector<8x128xf32> -> vector<8x128xf32>
    %124 = arith.mulf %44, %123 : vector<8x128xf32>
    %125 = arith.mulf %117, %124 : vector<8x128xf32>
    %126 = arith.truncf %125 : vector<8x128xf32> to vector<8x128xbf16>
    %c0_71 = arith.constant 0 : index
    %c0_72 = arith.constant 0 : index
    %127 = vector.load %arg13[%c0_71, %c0_72] : memref<128x128xbf16, #tpu.memory_space<vmem>>, vector<128x128xbf16>
    %cst_73 = arith.constant dense<0.000000e+00> : vector<8x128xf32>
    %128 = tpu.matmul %126, %127, %cst_73 {dimension_numbers = #tpu.dot_dimension_numbers<[1], [0], [0], [1], [0, 0, 1, 1], [], []>} : vector<8x128xbf16>, vector<128x128xbf16>, vector<8x128xf32> -> vector<8x128xf32>
    %c0_74 = arith.constant 0 : index
    %c0_75 = arith.constant 0 : index
    %c0_76 = arith.constant 0 : index
    %129 = vector.load %arg14[%c0_74, %c0_75, %c0_76] : memref<1x8x128xf32, #tpu.memory_space<vmem>>, vector<1x8x128xf32>
    %130 = vector.shape_cast %129 : vector<1x8x128xf32> to vector<8x128xf32>
    %131 = vector.shape_cast %128 : vector<8x128xf32> to vector<1x8x128xf32>
    tpu.vector_store %arg14[%c0_74, %c0_75, %c0_76], %131 {strides = array<i32>} : memref<1x8x128xf32, #tpu.memory_space<vmem>>, vector<1x8x128xf32>,
    return
  }
  func.func @transform_0(%arg0: i32, %arg1: i32) -> (i32, i32, i32) {
    %c0_i32 = arith.constant 0 : i32
    %c0_i32_0 = arith.constant 0 : i32
    return %arg0, %arg1, %c0_i32 : i32, i32, i32
  }
  func.func @transform_1(%arg0: i32, %arg1: i32) -> (i32, i32, i32) {
    %c0_i32 = arith.constant 0 : i32
    %c0_i32_0 = arith.constant 0 : i32
    return %arg0, %arg1, %c0_i32 : i32, i32, i32
  }
  func.func @transform_2(%arg0: i32, %arg1: i32) -> (i32, i32) {
    %c0_i32 = arith.constant 0 : i32
    %c0_i32_0 = arith.constant 0 : i32
    %c0_i32_1 = arith.constant 0 : i32
    return %c0_i32, %c0_i32_0 : i32, i32
  }
  func.func @transform_3(%arg0: i32, %arg1: i32) -> (i32, i32) {
    %c0_i32 = arith.constant 0 : i32
    %c0_i32_0 = arith.constant 0 : i32
    %c0_i32_1 = arith.constant 0 : i32
    return %c0_i32, %c0_i32_0 : i32, i32
  }
  func.func @transform_4(%arg0: i32, %arg1: i32) -> (i32, i32) {
    %c0_i32 = arith.constant 0 : i32
    %c0_i32_0 = arith.constant 0 : i32
    %c0_i32_1 = arith.constant 0 : i32
    return %c0_i32, %c0_i32_0 : i32, i32
  }
  func.func @transform_5(%arg0: i32, %arg1: i32) -> (i32, i32) {
    %c0_i32 = arith.constant 0 : i32
    %c0_i32_0 = arith.constant 0 : i32
    %c0_i32_1 = arith.constant 0 : i32
    return %c0_i32, %c0_i32_0 : i32, i32
  }
  func.func @transform_6(%arg0: i32, %arg1: i32) -> (i32, i32) {
    %c0_i32 = arith.constant 0 : i32
    %c0_i32_0 = arith.constant 0 : i32
    %c0_i32_1 = arith.constant 0 : i32
    return %c0_i32, %c0_i32_0 : i32, i32
  }
  func.func @transform_7(%arg0: i32, %arg1: i32) -> (i32, i32) {
    %c0_i32 = arith.constant 0 : i32
    %c0_i32_0 = arith.constant 0 : i32
    %c0_i32_1 = arith.constant 0 : i32
    return %c0_i32, %c0_i32_0 : i32, i32
  }
  func.func @transform_8(%arg0: i32, %arg1: i32) -> (i32, i32) {
    %c0_i32 = arith.constant 0 : i32
    %c0_i32_0 = arith.constant 0 : i32
    %c0_i32_1 = arith.constant 0 : i32
    return %c0_i32, %c0_i32_0 : i32, i32
  }
  func.func @transform_9(%arg0: i32, %arg1: i32) -> (i32, i32) {
    %c0_i32 = arith.constant 0 : i32
    %c0_i32_0 = arith.constant 0 : i32
    %c0_i32_1 = arith.constant 0 : i32
    return %c0_i32, %c0_i32_0 : i32, i32
  }
  func.func @transform_10(%arg0: i32, %arg1: i32) -> (i32, i32) {
    %c0_i32 = arith.constant 0 : i32
    %c0_i32_0 = arith.constant 0 : i32
    %c0_i32_1 = arith.constant 0 : i32
    return %c0_i32, %c0_i32_0 : i32, i32
  }
  func.func @transform_11(%arg0: i32, %arg1: i32) -> (i32, i32) {
    %c0_i32 = arith.constant 0 : i32
    %c0_i32_0 = arith.constant 0 : i32
    %c0_i32_1 = arith.constant 0 : i32
    return %c0_i32, %c0_i32_0 : i32, i32
  }
  func.func @transform_12(%arg0: i32, %arg1: i32) -> (i32, i32, i32) {
    %c0_i32 = arith.constant 0 : i32
    %c0_i32_0 = arith.constant 0 : i32
    return %arg0, %arg1, %c0_i32 : i32, i32, i32
  }
  func.func @transform_13(%arg0: i32, %arg1: i32) -> (i32, i32, i32) {
    %c0_i32 = arith.constant 0 : i32
    %c0_i32_0 = arith.constant 0 : i32
    return %arg0, %arg1, %c0_i32 : i32, i32, i32
  }
}

</mosaic_0001>

<bundles_post_ra>
// kernel: tpu_custom_call.1
= control target key start
LH: loop header
LB: loop body
LE: loop exit
PB: predicated region body
PF: predicated region fallthrough
CT: control target
= control target key end

     0   :  { %s3116_s0 = inlined_call_operand.hbm [shape: f32[2,16,128], index: 0, kind: input, shape index: {}]   ;;  %s3117_s1 = inlined_call_operand.hbm [shape: f32[2,16,128], index: 1, kind: input, shape index: {}]   ;;  %s3118_s2 = inlined_call_operand.hbm [shape: f32[1,128], index: 2, kind: input, shape index: {}]   ;;  %s3119_s3 = inlined_call_operand.hbm [shape: f32[1,128], index: 3, kind: input, shape index: {}]   ;;  %s3120_s4 = inlined_call_operand.hbm [shape: bf16[128,256], index: 4, kind: input, shape index: {}]   ;;  %s3121_s5 = inlined_call_operand.vmem [shape: f32[4,128], index: 5, kind: input, shape index: {}]   ;;  %s3122_s6 = inlined_call_operand.vmem [shape: f32[1,128], index: 6, kind: input, shape index: {}]   ;;  %s3123_s7 = inlined_call_operand.hbm [shape: bf16[128,384], index: 7, kind: input, shape index: {}]   ;;  %s3124_s8 = inlined_call_operand.vmem [shape: f32[1,128], index: 8, kind: input, shape index: {}]   ;;  %s3125_s9 = inlined_call_operand.hbm [shape: f32[16,128], index: 9, kind: input, shape index: {}]   ;;  %s3126_s10 = inlined_call_operand.vmem [shape: f32[1,128], index: 10, kind: input, shape index: {}]   ;;  %s3127_s11 = inlined_call_operand.hbm [shape: bf16[128,128], index: 11, kind: input, shape index: {}]   ;;  %s3128_s12 = inlined_call_operand.hbm [shape: f32[2,16,128], index: 12, kind: output, shape index: {0}]   ;;  %s3129_s13 = inlined_call_operand.hbm [shape: f32[2,16,128], index: 13, kind: output, shape index: {1}]  }
   0x1   :  { %3136 = sst [smem:[#allocation40_spill]] %s3118_s2 }
   0x2   :  { %3137 = sst [smem:[#allocation41_spill]] %s3119_s3 }
   0x3   :  { %3138 = sst [smem:[#allocation42_spill]] %s3120_s4 }
   0x4   :  { %3139 = sst [smem:[#allocation43_spill]] %s3122_s6 }
   0x5   :  { %3140 = sst [smem:[#allocation44_spill]] %s3123_s7 }
   0x6   :  { %3141 = sst [smem:[#allocation45_spill]] %s3124_s8 }
   0x7   :  { %3142 = sst [smem:[#allocation46_spill]] %s3125_s9 }
   0x8   :  { %3143 = sst [smem:[#allocation47_spill]] %s3126_s10 }
   0x9   :  { %3144 = sst [smem:[#allocation48_spill]] %s3127_s11 }
   0xa   :  { %3145 = sst [smem:[#allocation49_spill]] %s3128_s12 }
   0xb   :  { %3146 = sst [smem:[#allocation50_spill]] %s3129_s13 }
   0xc   :  { %19 = vsyncpa [#allocation11], 0 }
   0xd   :  { %21 = vsyncpa [#allocation11 + $0x1], 0 }
   0xe   :  { %22 = vsyncpa [#allocation14], 0 }
   0xf   :  { %24 = vsyncpa [#allocation14 + $0x1], 0 }
  0x10   :  { %25 = vsyncpa [#allocation17], 0 }
  0x11   :  { %26 = vsyncpa [#allocation20], 0 }
  0x12   :  { %27 = vsyncpa [#allocation23], 0 }
  0x13   :  { %28 = vsyncpa [#allocation12], 0 }
  0x14   :  { %30 = vsyncpa [#allocation12 + $0x1], 0 }
  0x15   :  { %31 = vsyncpa [#allocation26], 0 }
  0x16   :  { %33 = vsyncpa [#allocation26 + $0x1], 0  ;;  %s2747_s25 = smov 0   ;;  %s2749_s26 = smov 0  }
  0x17   :  { %s2751_s27 = smov 0   ;;  %s2753_s28 = smov 0  }
  0x18   :  { %s2755_s29 = smov 0   ;;  %s2757_s30 = smov 0  }
  0x19   :  { %s2759_s14 = smov 0   ;;  %s2761_s15 = smov 0  }
  0x1a LB: > { %3147 = sst [smem:[#allocation35_spill]] %s2637_s29  ;;  %s2788_s16 = sadd.s32 4294967295, %s2649_s15   ;;  %s2649_s15 = sphi %s2761_s15, %s39_s15   ;;  %s2645_s14 = sphi %s2759_s14, %s3175_s14   ;;  %s2641_s30 = sphi %s2757_s30, %s3174_s30   ;;  %s2637_s29 = sphi %s2755_s29, %s3179_s29   ;;  %s2633_s28 = sphi %s2753_s28, %s3172_s28   ;;  %s2629_s27 = sphi %s2751_s27, %s3178_s27   ;;  %s2625_s26 = sphi %s2749_s26, %s3177_s26   ;;  %s2621_s25 = sphi %s2747_s25, %s3176_s25  }
  0x1b   : > { %3148 = sst [smem:[#allocation36_spill]] %s2641_s30  ;;  %p1703_p0 = scmp.ge.s32.totalorder %s2649_s15, 1 }
  0x1c   : > { %3149 = sst [smem:[#allocation37_spill]] %s2645_s14  ;;  %p74_p1 = scmp.eq.s32.totalorder %s2788_s16, 0 }
  0x1d   : > { %p378_p2 = scmp.lt.s32.totalorder %s2649_s15, 5  ;;  %s3150_s2 = sld [smem:[#allocation40_spill]] }
  0x1e   : > { %s2663_s21 = smov [#allocation15]   ;;  %s3152_s3 = sld [smem:[#allocation41_spill]] }
  0x1f   : > { %p2796_p3 = pnand %p1703_p0, %p378_p2  ;;  %s392_s22 = sshll.u32 %s2663_s21, 4  ;;  %s393_s22 = int_to_ptr.vmem [resolvable:$true] %s392_s22 }
  0x20   : > { %s3154_s7 = sld [smem:[#allocation44_spill]]  ;;  %s2664_s29 = smov [#allocation16]  }
  0x21   : > { %p2047_p4 = pneg %p2796_p3  ;;  %s404_s21 = sshll.u32 %s2664_s29, 4  ;;  %s405_s21 = int_to_ptr.vmem [resolvable:$true] %s404_s21 }
  0x22   : > { %s2665_s23 = smov [#allocation19]   ;;  %s3155_s4 = sld [smem:[#allocation42_spill]] }
  0x23   : > { %s390_s19 = sshll.u32 %s3150_s2, 4  ;;  %p2807_p5 = pnand %p2047_p4, %p74_p1  ;;  %s391_s19 = int_to_ptr.hbm [resolvable:$true] %s390_s19 }
  0x24   : > { %s402_s12 = sshll.u32 %s3152_s3, 4  ;;  %s435_s24 = sshll.u32 %s2665_s23, 4  ;;  %s403_s12 = int_to_ptr.hbm [resolvable:$true] %s402_s12  ;;  %s436_s24 = int_to_ptr.vmem [resolvable:$true] %s435_s24 }
  0x25   : > { %2050 = dma.hbm_to_vmem [thread:$0]  (!%p2807_p5), %s391_s19, 16, %s393_s22, [#allocation14]  }
  0x26   : > { %s433_s2 = sshll.u32 %s3154_s7, 4  ;;  %s2666_s6 = smov 192   ;;  %s434_s2 = int_to_ptr.hbm [resolvable:$true] %s433_s2 }
  0x27   : > { %2053 = dma.hbm_to_vmem [thread:$0]  (!%p2807_p5), %s403_s12, 16, %s405_s21, [#allocation17]  }
  0x28   : > { %s413_s8 = sshll.u32 %s3155_s4, 4  ;;  %s2667_s17 = smov 12   ;;  %s414_s8 = int_to_ptr.hbm [resolvable:$true] %s413_s8 }
  0x29   : > { %2059 = dma.hbm_to_vmem [thread:$0]  (!%p2807_p5), %s434_s2, 3072, %s436_s24, [#allocation20], %s2666_s6, %s2666_s6, %s2667_s17  }
  0x2a   : > { %s2668_s29 = smov [#allocation18]   ;;  %s2669_s22 = smov 128  }
  0x2b   : > { %s415_s19 = sshll.u32 %s2668_s29, 4  ;;  %s2670_s18 = smov 8   ;;  %s416_s19 = int_to_ptr.vmem [resolvable:$true] %s415_s19 }
  0x2c   : > { %2056 = dma.hbm_to_vmem [thread:$0]  (!%p2807_p5), %s414_s8, 2048, %s416_s19, [#allocation17], %s2669_s22, %s2669_s22, %s2670_s18  }
  0x2d   : > { %s3156_s9 = sld [smem:[#allocation46_spill]]  ;;  %s2671_s10 = smov [#allocation21]  }
  0x2e   : > { %s452_s2 = sshll.u32 %s2671_s10, 4  ;;  %s3157_s11 = sld [smem:[#allocation48_spill]]  ;;  %s453_s2 = int_to_ptr.vmem [resolvable:$true] %s452_s2 }
  0x2f   : > { %s2672_s8 = smov [#allocation22]   ;;  %s2673_s29 = smov 64  }
  0x30   : > { %s469_s17 = sshll.u32 %s2672_s8, 4  ;;  %s2674_s19 = smov 4   ;;  %s470_s17 = int_to_ptr.vmem [resolvable:$true] %s469_s17 }
  0x31   : > { %s1702_s12 = sadd.s32 4294967294, %s2649_s15   ;;  %s48_s21 = sadd.s32 1, %s2641_s30 }
  0x32   : > { %p49_p6 = scmp.ge.s32.totalorder %s48_s21, 2  ;;  %s51_s10 = sadd.s32 1, %s2645_s14 }
  0x33   : > { %s450_s3 = sshll.u32 %s3156_s9, 4  ;;  %p67_p7 = scmp.ne.s32.totalorder %s2629_s27, %s2625_s26  ;;  %s451_s3 = int_to_ptr.hbm [resolvable:$true] %s450_s3 }
  0x34   : > { %s467_s24 = sshll.u32 %s3157_s11, 4  ;;  %s3181_s21 = smov (%p49_p6, %s48_s21), 0  ;;  %s468_s24 = int_to_ptr.hbm [resolvable:$true] %s467_s24 }
  0x35   : > { %2062 = dma.hbm_to_vmem [thread:$0]  (!%p2807_p5), %s451_s3, 256, %s453_s2, [#allocation20], %s2669_s22, %s2669_s22, %s2670_s18  }
  0x36   : > { %2065 = dma.hbm_to_vmem [thread:$0]  (!%p2807_p5), %s468_s24, 1024, %s470_s17, [#allocation23], %s2673_s29, %s2673_s29, %s2674_s19  }
  0x37   : > { %s60_s22 = sadd.s32 1, %s2629_s27  ;;  %3158 = sst [smem:[#allocation38_spill]] %s3181_s21 }
  0x38   : > { %s3183_s10 = smov (!%p49_p6, %s51_s10), %s2645_s14  ;;  %s56_s18 = ssub.s32 %s2641_s30, %s3181_s21 }
  0x39   : > { %p68_p8 = scmp.eq.s32.totalorder %s2649_s15, 0  ;;  %p53_p9 = scmp.ge.s32.totalorder %s3183_s10, 2 }
  0x3a   : > { %p73_p10 = scmp.ne.s32.totalorder %s2625_s26, %s2621_s25  ;;  %p337_p12 = scmp.eq.s32.totalorder %s2788_s16, 3 }
  0x3b   : > { %p2849_p11 = por %p68_p8, %p67_p7  ;;  %s3185_s10 = smov (%p53_p9, %s3183_s10), 0 }
  0x3c   : > { %3160 = sst [smem:[#allocation39_spill]] %s3185_s10  ;;  %p2858_p13 = por %p74_p1, %p73_p10 }
  0x3d   : > { %p2862_p0 = por %p337_p12, %p67_p7  ;;  %s55_s6 = ssub.s32 %s2645_s14, %s3185_s10 }
  0x3e   : > { %p343_p2 = scmp.eq.s32.totalorder %s1702_s12, 3  ;;  %s57_s23 = sor.u32 %s56_s18, %s55_s6 }
  0x3f   : > { %p2086_p4 = scmp.lt.s32.totalorder %s2649_s15, 4  ;;  %p58_p5 = scmp.eq.s32.totalorder %s57_s23, 0 }
  0x40   : > { %p2869_p6 = por %p343_p2, %p73_p10  ;;  %s483_s8 = sand.u32 1, %s2629_s27  }
  0x41   : > { %s1712_s17 = sshll.u32 %s2645_s14, 1  ;;  %s1711_s19 = sshll.u32 %s483_s8, 3 }
  0x42   : > { %s2876_s29 = scalar_select %p58_p5, %s2629_s27, %s60_s22  }
  0x43   : > { %s491_s4 = sadd.s32 %s2641_s30, %s1712_s17  ;;  %s487_s9 = scalar_lea.vmem [#allocation10], %s1711_s19 }
  0x44   : > { %s1713_s7 = sshll.u32 %s491_s4, 3  ;;  %s497_s11 = sshll.u32 %s487_s9, 4  ;;  %s498_s11 = int_to_ptr.vmem [resolvable:$true] %s497_s11 }
  0x45   : > { %s493_s18 = scalar_lea.hbm %s3116_s0, %s1713_s7  ;;  %p2067_p7 = pnand %p2086_p4, %p2849_p11 }
  0x46   : > { %s495_s6 = sshll.u32 %s493_s18, 4  ;;  %s514_s22 = scalar_lea.hbm %s3117_s1, %s1713_s7  ;;  %s496_s6 = int_to_ptr.hbm [resolvable:$true] %s495_s6 }
  0x47   : > { %s484_s14 = scalar_lea.sflag [#allocation11], %s483_s8  ;;  %s504_s17 = sand.u32 1, %s2649_s15  }
  0x48   : > { %2069 = dma.hbm_to_vmem [thread:$0]  (!%p2067_p7), %s496_s6, 128, %s498_s11, %s484_s14  }
  0x49   : > { %s516_s4 = sshll.u32 %s514_s22, 4  ;;  %s508_s9 = scalar_lea.vmem [#allocation13], %s1711_s19  ;;  %s517_s4 = int_to_ptr.hbm [resolvable:$true] %s516_s4 }
  0x4a   : > { %s518_s30 = sshll.u32 %s508_s9, 4  ;;  %s505_s10 = scalar_lea.sflag [#allocation14], %s504_s17  ;;  %s519_s30 = int_to_ptr.vmem [resolvable:$true] %s518_s30 }
  0x4b   : > { %2072 = dma.hbm_to_vmem [thread:$0]  (!%p2067_p7), %s517_s4, 128, %s519_s30, %s505_s10  }
  0x4c   : > { %527 = sbr.rel (%p2796_p3) target bundleno = 1133 (0x46d), region = 68  ;;  %s2893_s13 = sand.u32 (!%p2796_p3), 1, %s2625_s26  }
  0x4d   : > { %s2896_s7 = sshll.u32 (!%p2796_p3), %s2893_s13, 3  ;;  %s530_s11 = scalar_lea.sflag (!%p2796_p3), [#allocation11], %s2893_s13 }
  0x4e   : > { %s533_s14 = scalar_lea.vmem (!%p2796_p3), [#allocation10], %s2896_s7 }
  0x51   : > { %2588 = dma.done.wait (%p2858_p13), %s530_s11, 128  }
  0x52   : > { %2590 = vsyncadd (%p2858_p13), %s530_s11, 4294967168  ;;  %s539_s30 = sand.u32 1, %s2788_s16   ;;  %s543_s21 = scalar_lea.vmem [#allocation13], %s2896_s7 }
  0x53   : > { %s540_s20 = scalar_lea.sflag [#allocation14], %s539_s30 }
  0x54   : > { %2592 = dma.done.wait (%p2858_p13), %s540_s20, 128  }
  0x55   : > { %2594 = vsyncadd (%p2858_p13), %s540_s20, 4294967168 }
  0x56   : > { %2596 = dma.done.wait (%p74_p1), [#allocation14], 16  }
  0x57   : > { %2598 = vsyncadd (%p74_p1), [#allocation14], 4294967280 }
  0x58   : > { %2600 = dma.done.wait (%p74_p1), [#allocation17], 2064  }
  0x59   : > { %2602 = vsyncadd (%p74_p1), [#allocation17], 4294965232 }
  0x5a   : > { %2604 = dma.done.wait (%p74_p1), [#allocation20], 3328  }
  0x5b   : > { %2606 = vsyncadd (%p74_p1), [#allocation20], 4294963968 }
  0x5c   : > { %2608 = dma.done.wait (%p74_p1), [#allocation23], 1024  }
  0x5d   : > { %2610 = vsyncadd (%p74_p1), [#allocation23], 4294966272  ;;  %s619_s3 = scalar_lea.vmem [#allocation24], %s2896_s7  ;;  %s626_s8 = scalar_lea.vmem [#allocation25], %s2896_s7 }
  0x5e   : > { %p1728_p3 = scmp.ne.s32.totalorder %s2633_s28, 0 }
  0x60   : > { %630 = sbr.rel (%p1728_p3) target bundleno = 105 (0x69), region = 104 }
  0x65   : > { %v2675_v0 = vmov 0.0  }
  0x66   : > { %631 = vst [vmem:[#allocation8] sm:$0xff] %v2675_v0 }
  0x67   : > { %632 = vst [vmem:[#allocation8 + $0x8] sm:$0xff] %v2675_v0 }
  0x68   : > { %633 = vst [vmem:[#allocation9] sm:$0x7] %v2675_v0 }
  0x69 PF: > { %v634_v1 = vld [vmem:[%s533_s14] sm:$0xff]  ;;  %v635_v2 = vld [vmem:[%s543_s21] sm:$0xff]  ;;  %v642_v4 = vlaneseq  ;;  %v2676_v10 = vmov 0.0   ;;  %s3164_s6 = sld [smem:[#allocation43_spill]]  ;;  %vm1047_vm6 = vcmask 130048   ;;  %s2975_s20 = smov 0  }
  0x6a   : > { %v636_v3 = vadd.f32 %v635_v2, %v634_v1  ;;  %v1788_v8 = vld [vmem:[#allocation18 + $0x70] sm:$0xf]  ;;  %v1982_v9 = vld [vmem:[#allocation18 + $0x74] sm:$0xf0]  ;;  %v1981_v13 = vld [vmem:[#allocation18 + $0x74] sm:$0xf] }
  0x6b   : > { %v643_v5 = vand.u32 127, %v642_v4  ;;  %v1053_v6 = vshrl.u32 %v642_v4, 7  ;;  %v1789_v12 = vor.u32 %v1982_v9, %v1788_v8  ;;  %v1790_v14 = vld [vmem:[#allocation18 + $0x78] sm:$0xf0]  ;;  %v1780_v23 = vld [vmem:[#allocation18 + $0x60] sm:$0xf] }
  0x6c   : > { %638 = vadd.xlane.f32.xlu0 %v636_v3  ;;  %637 = vst [vmem:[%s626_s8] sm:$0xff] %v636_v3  ;;  %v1793_v15 = vor.u32 %v1981_v13, %v1790_v14  ;;  %v1980_v24 = vld [vmem:[#allocation18 + $0x64] sm:$0xf0]  ;;  %v1979_v25 = vld [vmem:[#allocation18 + $0x64] sm:$0xf]  ;;  %v1782_v27 = vld [vmem:[#allocation18 + $0x68] sm:$0xf0] }
  0x6d   : > { %v1054_v7 = vadd.s32 8, %v1053_v6  ;;  %vm1055_vm0 = vcmp.eq.s32.totalorder %v1053_v6, %v643_v5  ;;  %771 = vmatpush.bf16.msra.mxu0 %v1789_v12  ;;  %vm644_vm2 = vcmp.lt.s32.totalorder %v643_v5, 32  ;;  %v1781_v26 = vor.u32 %v1980_v24, %v1780_v23  ;;  %v1772_v29 = vld [vmem:[#allocation18 + $0x50] sm:$0xf]  ;;  %v1978_v30 = vld [vmem:[#allocation18 + $0x54] sm:$0xf0] }
  0x6e   : > { %v2931_v11 = vsel %vm1055_vm0, 1.0, %v2676_v10  ;;  %784 = vmatpush.bf16.msra.mxu1 %v1793_v15  ;;  %v1729_v19 = vsel %vm644_vm2, 1.0, %v2676_v10  ;;  %v1785_v28 = vor.u32 %v1979_v25, %v1782_v27  ;;  %v1977_v31 = vld [vmem:[#allocation18 + $0x54] sm:$0xf]  ;;  %v1773_v32 = vor.u32 %v1978_v30, %v1772_v29  ;;  %v1774_v33 = vld [vmem:[#allocation18 + $0x58] sm:$0xf0] }
  0x6f   : > { %vm1056_vm1 = vcmp.eq.s32.totalorder %v1054_v7, %v643_v5  ;;  %v1777_v34 = vor.u32 %v1977_v31, %v1774_v33  ;;  %v1764_v35 = vld [vmem:[#allocation18 + $0x40] sm:$0xf]  ;;  %v1976_v36 = vld [vmem:[#allocation18 + $0x44] sm:$0xf0]  ;;  %v1975_v37 = vld [vmem:[#allocation18 + $0x44] sm:$0xf] }
  0x70   : > { %v2933_v16 = vsel %vm1056_vm1, 1.0, %v2676_v10  ;;  %v1765_v38 = vor.u32 %v1976_v36, %v1764_v35  ;;  %v1766_v39 = vld [vmem:[#allocation18 + $0x48] sm:$0xf0]  ;;  %v1756_v41 = vld [vmem:[#allocation18 + $0x30] sm:$0xf]  ;;  %s3165_s30 = sld [smem:[#allocation45_spill]] }
  0x71   : > { %772 = vmatpush.bf16.msra.mxu0 %v1781_v26  ;;  %v1769_v40 = vor.u32 %v1975_v37, %v1766_v39  ;;  %v1974_v42 = vld [vmem:[#allocation18 + $0x34] sm:$0xf0]  ;;  %v1973_v43 = vld [vmem:[#allocation18 + $0x34] sm:$0xf]  ;;  %v1758_v45 = vld [vmem:[#allocation18 + $0x38] sm:$0xf0] }
  0x72   : > { %785 = vmatpush.bf16.msra.mxu1 %v1785_v28  ;;  %v1757_v44 = vor.u32 %v1974_v42, %v1756_v41  ;;  %v1761_v46 = vor.u32 %v1973_v43, %v1758_v45  ;;  %v1748_v47 = vld [vmem:[#allocation18 + $0x20] sm:$0xf]  ;;  %v1972_v48 = vld [vmem:[#allocation18 + $0x24] sm:$0xf0]  ;;  %v1971_v49 = vld [vmem:[#allocation18 + $0x24] sm:$0xf] }
  0x73   : > { %v1749_v50 = vor.u32 %v1972_v48, %v1748_v47  ;;  %v1750_v51 = vld [vmem:[#allocation18 + $0x28] sm:$0xf0]  ;;  %v1740_v53 = vld [vmem:[#allocation18 + $0x10] sm:$0xf]  ;;  %v1970_v54 = vld [vmem:[#allocation18 + $0x14] sm:$0xf0] }
  0x74   : > { %v1753_v52 = vor.u32 %v1971_v49, %v1750_v51  ;;  %v1969_v55 = vld [vmem:[#allocation18 + $0x14] sm:$0xf]  ;;  %v1741_v56 = vor.u32 %v1970_v54, %v1740_v53  ;;  %v1742_v57 = vld [vmem:[#allocation18 + $0x18] sm:$0xf0]  ;;  %v1732_v58 = vld [vmem:[#allocation18] sm:$0xf] }
  0x75   : > { %773 = vmatpush.bf16.msra.mxu0 %v1773_v32  ;;  %v1968_v59 = vld [vmem:[#allocation18 + $0x4] sm:$0xf0]  ;;  %v1745_v60 = vor.u32 %v1969_v55, %v1742_v57  ;;  %v1967_v61 = vld [vmem:[#allocation18 + $0x4] sm:$0xf]  ;;  %v1734_v62 = vld [vmem:[#allocation18 + $0x8] sm:$0xf0] }
  0x76   : > { %786 = vmatpush.bf16.msra.mxu1 %v1777_v34  ;;  %v1733_v63 = vor.u32 %v1968_v59, %v1732_v58  ;;  %v1737_v0 = vor.u32 %v1967_v61, %v1734_v62  ;;  %v2196_v10 = vld [vmem:[#allocation15] ss:$0 sm:$0xff]  ;;  %v2197_v14 = vld [vmem:[#allocation16] ss:$0 sm:$0xff]  ;;  %v2004_v23 = vld [vmem:[#allocation19 + $0xac] sm:$0xf] }
  0x77   : > { %v1882_v25 = vld [vmem:[#allocation19 + $0xb4] sm:$0xf0]  ;;  %v1888_v26 = vld [vmem:[#allocation19 + $0xb0] sm:$0xf]  ;;  %v2006_v27 = vld [vmem:[#allocation19 + $0xb8] sm:$0xf0] }
  0x78   : > { %v1885_v28 = vor.u32 %v2004_v23, %v1882_v25  ;;  %v1889_v29 = vor.u32 %v2006_v27, %v1888_v26  ;;  %v1868_v30 = vld [vmem:[#allocation19 + $0x90] sm:$0xf]  ;;  %v2002_v31 = vld [vmem:[#allocation19 + $0x98] sm:$0xf0]  ;;  %v1870_v33 = vld [vmem:[#allocation19 + $0x9c] sm:$0xf0] }
  0x79   : > { %774 = vmatpush.bf16.msra.mxu0 %v1765_v38  ;;  %v1869_v32 = vor.u32 %v2002_v31, %v1868_v30  ;;  %v1876_v34 = vld [vmem:[#allocation19 + $0x98] sm:$0xf]  ;;  %v2003_v35 = vld [vmem:[#allocation19 + $0xa0] sm:$0xf0]  ;;  %v1858_v41 = vld [vmem:[#allocation19 + $0x84] sm:$0xf0] }
  0x7a   : > { %787 = vmatpush.bf16.msra.mxu1 %v1769_v40  ;;  %1005 = vmatpush.bf16.msra.mxu3 %v1885_v28  ;;  %v1877_v37 = vor.u32 %v2003_v35, %v1876_v34  ;;  %v1856_v38 = vld [vmem:[#allocation19 + $0x78] sm:$0xf]  ;;  %v1999_v39 = vld [vmem:[#allocation19 + $0x80] sm:$0xf0]  ;;  %v1998_v40 = vld [vmem:[#allocation19 + $0x7c] sm:$0xf] }
  0x7b   : > { %v1864_v42 = vld [vmem:[#allocation19 + $0x80] sm:$0xf]  ;;  %v2000_v43 = vld [vmem:[#allocation19 + $0x88] sm:$0xf0]  ;;  %v1861_v45 = vor.u32 %v1998_v40, %v1858_v41  ;;  %v1995_v49 = vld [vmem:[#allocation19 + $0x64] sm:$0xf] }
  0x7c   : > { %v1844_v47 = vld [vmem:[#allocation19 + $0x60] sm:$0xf]  ;;  %v1996_v48 = vld [vmem:[#allocation19 + $0x68] sm:$0xf0]  ;;  %v1852_v51 = vld [vmem:[#allocation19 + $0x68] sm:$0xf] }
  0x7d   : > { %775 = vmatpush.bf16.msra.mxu0 %v1757_v44  ;;  %v1857_v44 = vor.u32 %v1999_v39, %v1856_v38  ;;  %v1845_v53 = vor.u32 %v1996_v48, %v1844_v47  ;;  %v1993_v57 = vld [vmem:[#allocation19 + $0x50] sm:$0xf0]  ;;  %v1992_v58 = vld [vmem:[#allocation19 + $0x4c] sm:$0xf]  ;;  %v1834_v59 = vld [vmem:[#allocation19 + $0x54] sm:$0xf0] }
  0x7e   : > { %788 = vmatpush.bf16.msra.mxu1 %v1761_v46  ;;  %v1865_v46 = vor.u32 %v2000_v43, %v1864_v42  ;;  %v1994_v61 = vld [vmem:[#allocation19 + $0x58] sm:$0xf0]  ;;  %v1984_v25 = vld [vmem:[#allocation19 + $0x8] sm:$0xf0]  ;;  %v1983_v26 = vld [vmem:[#allocation19 + $0x4] sm:$0xf] }
  0x7f   : > { %v1798_v27 = vld [vmem:[#allocation19 + $0xc] sm:$0xf0]  ;;  %v1804_v28 = vld [vmem:[#allocation19 + $0x8] sm:$0xf] }
  0x80   : > { %v1801_v31 = vor.u32 %v1983_v26, %v1798_v27  ;;  %v2200_v34 = vld [vmem:[%s3121_s5 + $0x1] ss:$0 sm:$0xff]  ;;  %v2201_v40 = vld [vmem:[%s3121_s5 + $0x2] ss:$0 sm:$0xff] }
  0x81   : > { %776 = vmatpush.bf16.msra.mxu0 %v1749_v50  ;;  %v1846_v50 = vld [vmem:[#allocation19 + $0x6c] sm:$0xf0] }
  0x82   : > { %789 = vmatpush.bf16.msra.mxu1 %v1753_v52  ;;  %v1997_v52 = vld [vmem:[#allocation19 + $0x70] sm:$0xf0]  ;;  %v1849_v54 = vor.u32 %v1995_v49, %v1846_v50 }
  0x83   : > { %v1853_v55 = vor.u32 %v1997_v52, %v1852_v51 }
  0x85   : > { %777 = vmatpush.bf16.msra.mxu0 %v1741_v56  ;;  %v1832_v56 = vld [vmem:[#allocation19 + $0x48] sm:$0xf] }
  0x86   : > { %790 = vmatpush.bf16.msra.mxu1 %v1745_v60  ;;  %v1840_v60 = vld [vmem:[#allocation19 + $0x50] sm:$0xf]  ;;  %v1833_v62 = vor.u32 %v1993_v57, %v1832_v56 }
  0x89   : > { %778 = vmatpush.bf16.msra.mxu0 %v1733_v63  ;;  %v1837_v63 = vor.u32 %v1992_v58, %v1834_v59  ;;  %v2962_v58 = vld [vmem:[#allocation21] sm:$0xff]  ;;  %v2964_v59 = vld [vmem:[#allocation21 + $0x8] sm:$0xff] }
  0x8a   : > { %791 = vmatpush.bf16.msra.mxu1 %v1737_v0  ;;  %v1841_v0 = vor.u32 %v1994_v61, %v1840_v60  ;;  %v1061_v60 = vld [vmem:[#allocation8] sm:$0xff]   ;;  %v2203_v61 = vld [vmem:[%s3165_s30] ss:$0 sm:$0xff] }
  0x8d   : > { %1018 = vmatpush.bf16.msrb.mxu0 %v1889_v29  ;;  %v1985_v29 = vld [vmem:[#allocation19 + $0x10] sm:$0xf0] }
  0x91   : > { %1019 = vmatpush.bf16.msrb.mxu0 %v1877_v37 }
  0x95   : > { %1020 = vmatpush.bf16.msrb.mxu0 %v1865_v46 }
  0x99   : > { %1021 = vmatpush.bf16.msrb.mxu0 %v1853_v55 }
  0x9d   : > { %1022 = vmatpush.bf16.msrb.mxu0 %v1841_v0 }
  0xdf   : > { %v639_v17 = vpop.xlane.xlu0 %638 }
  0xe0   : > { %v640_v18 = vmul.f32 0.03125, %v639_v17 }
  0xe2   : > { %v641_v20 = vsub.f32 %v636_v3, %v640_v18 }
  0xe4   : > { %v2935_v21 = vmul.f32 %v1729_v19, %v641_v20  ;;  %v797_v19 = vld [vmem:[#allocation9] sm:$0x7]  ;;  %v1880_v20 = vld [vmem:[#allocation19 + $0xa8] sm:$0xf] }
  0xe5   : > { %798 = vst [vmem:[#allocation7 + $0x5] sm:$0x7] %v797_v19  ;;  %v1796_v19 = vld [vmem:[#allocation19] sm:$0xf] }
  0xe6   : > { %v648_v22 = vmul.f32 %v2935_v21, %v2935_v21  ;;  %v1797_v30 = vor.u32 %v1984_v25, %v1796_v19 }
  0xe8   : > { %649 = vadd.xlane.f32.xlu0 %v648_v22  ;;  %v2005_v22 = vld [vmem:[#allocation19 + $0xb0] sm:$0xf0] }
  0xe9   : > { %v1881_v24 = vor.u32 %v2005_v22, %v1880_v20 }
  0xeb   : > { %992 = vmatpush.bf16.msra.mxu2 %v1881_v24 }
  0xef   : > { %993 = vmatpush.bf16.msra.mxu2 %v1869_v32  ;;  %v2199_v32 = vld [vmem:[%s3121_s5] ss:$0 sm:$0xff] }
  0xf3   : > { %994 = vmatpush.bf16.msra.mxu2 %v1857_v44  ;;  %v2202_v44 = vld [vmem:[%s3121_s5 + $0x3] ss:$0 sm:$0xff] }
  0xf7   : > { %995 = vmatpush.bf16.msra.mxu2 %v1845_v53 }
  0xfb   : > { %996 = vmatpush.bf16.msra.mxu2 %v1833_v62  ;;  %v1062_v62 = vld [vmem:[#allocation8 + $0x8] sm:$0xff]  }
 0x15b   : > { %v650_v1 = vpop.xlane.xlu0 %649 }
 0x15c   : > { %v651_v2 = vmul.f32 0.03125, %v650_v1  ;;  %v1820_v1 = vld [vmem:[#allocation19 + $0x30] sm:$0xf] }
 0x15e   : > { %v652_v3 = vadd.f32 1e-05, %v651_v2  ;;  %v1990_v2 = vld [vmem:[#allocation19 + $0x38] sm:$0xf0] }
 0x160   : > { %2204 = vrsqrt.f32 %v652_v3  ;;  %vm659_vm4 = vweird.f32 %v652_v3 }
 0x166   : > { %v2205_v4 = vpop.eup %2204 }
 0x167   : > { %v654_v5 = vmul.f32 %v2205_v4, %v652_v3  ;;  %vm660_vm3 = vweird.f32 %v2205_v4  ;;  %v1989_v3 = vld [vmem:[#allocation19 + $0x34] sm:$0xf] }
 0x168   : > { %vm661_vm5 = vmor %vm659_vm4, %vm660_vm3 }
 0x169   : > { %v655_v6 = vmul.f32 %v2205_v4, %v654_v5  ;;  %v1828_v5 = vld [vmem:[#allocation19 + $0x38] sm:$0xf] }
 0x16b   : > { %v656_v7 = vmul.f32 0.5, %v655_v6  ;;  %v1991_v6 = vld [vmem:[#allocation19 + $0x40] sm:$0xf0] }
 0x16d   : > { %v657_v8 = vsub.f32 1.5, %v656_v7  ;;  %v1821_v7 = vor.u32 %v1990_v2, %v1820_v1 }
 0x16f   : > { %v658_v9 = vmul.f32 %v2205_v4, %v657_v8  ;;  %997 = vmatpush.bf16.msra.mxu2 %v1821_v7 }
 0x171   : > { %v662_v12 = vsel %vm661_vm5, %v2205_v4, %v658_v9  ;;  %v1822_v4 = vld [vmem:[#allocation19 + $0x3c] sm:$0xf0]  ;;  %v1829_v9 = vor.u32 %v1991_v6, %v1828_v5 }
 0x172   : > { %v663_v13 = vmul.f32 %v662_v12, %v2935_v21  ;;  %v2001_v21 = vld [vmem:[#allocation19 + $0x94] sm:$0xf]  ;;  %v1825_v8 = vor.u32 %v1989_v3, %v1822_v4  ;;  %v1987_v12 = vld [vmem:[#allocation19 + $0x20] sm:$0xf0] }
 0x173   : > { %v1873_v36 = vor.u32 %v2001_v21, %v1870_v33  ;;  %1023 = vmatpush.bf16.msrb.mxu0 %v1829_v9  ;;  %v1805_v21 = vor.u32 %v1985_v29, %v1804_v28  ;;  %v2198_v33 = vld [vmem:[%s3164_s6] ss:$0 sm:$0xff] }
 0x174   : > { %v668_v15 = vmul.f32 %v2196_v10, %v663_v13  ;;  %v1808_v10 = vld [vmem:[#allocation19 + $0x18] sm:$0xf]  ;;  %v1986_v13 = vld [vmem:[#allocation19 + $0x1c] sm:$0xf] }
 0x175   : > { %1006 = vmatpush.bf16.msra.mxu3 %v1873_v36 }
 0x176   : > { %v673_v17 = vadd.f32 %v2197_v14, %v668_v15  ;;  %v1810_v14 = vld [vmem:[#allocation19 + $0x24] sm:$0xf0]  ;;  %v1816_v15 = vld [vmem:[#allocation19 + $0x20] sm:$0xf] }
 0x177   : > { %v1813_v23 = vor.u32 %v1986_v13, %v1810_v14 }
 0x178   : > { %v674_v18 = vpack.c.bf16 %v673_v17, %v673_v17  ;;  %v1988_v17 = vld [vmem:[#allocation19 + $0x28] sm:$0xf0] }
 0x179   : > { %1007 = vmatpush.bf16.msra.mxu3 %v1861_v45  ;;  %v1817_v24 = vor.u32 %v1988_v17, %v1816_v15 }
 0x17a   : > { %779 = vmatmul.bf16.vlgmr.msra.gmra.mxu0 %v674_v18  ;;  %792 = vmatmul.bf16.vlgmr.msra.gmra.mxu1 %v674_v18  ;;  %v1809_v18 = vor.u32 %v1987_v12, %v1808_v10 }
 0x17b   : > { %1024 = vmatpush.bf16.msrb.mxu0 %v1817_v24 }
 0x17c   : > { %998 = vmatpush.bf16.msra.mxu2 %v1809_v18 }
 0x17d   : > { %1008 = vmatpush.bf16.msra.mxu3 %v1849_v54 }
 0x17f   : > { %1025 = vmatpush.bf16.msrb.mxu0 %v1805_v21 }
 0x180   : > { %999 = vmatpush.bf16.msra.mxu2 %v1797_v30 }
 0x181   : > { %1009 = vmatpush.bf16.msra.mxu3 %v1837_v63 }
 0x185   : > { %1010 = vmatpush.bf16.msra.mxu3 %v1825_v8 }
 0x189   : > { %1011 = vmatpush.bf16.msra.mxu3 %v1813_v23 }
 0x18d   : > { %1012 = vmatpush.bf16.msra.mxu3 %v1801_v31 }
 0x1f7   : > { %v780_v20 = vpop.f32.mrf.mxu0  ;;  %v2940_v22 = vpop.f32.mrf.mxu1 }
 0x1f8   : > { %799 = vst [vmem:[#allocation7 + $0x8] sm:$0xff] %v780_v20  ;;  %v823_v48 = vmul.f32 %v2202_v44, %v780_v20 }
 0x1f9   : > { %800 = vst [vmem:[#allocation9 - $0x5] sm:$0xe0] %v780_v20 }
 0x1ff   : > { %v782_v35 = vpop.f32.mrf.mxu0  ;;  %v795_v36 = vpop.f32.mrf.mxu1  ;;  %v806_v37 = vld [vmem:[#allocation7 + $0x5] sm:$0xff] }
 0x200   : > { %v811_v38 = vld [vmem:[#allocation7 + $0x6] sm:$0xff]  ;;  %v808_v39 = vmul.f32 %v2199_v32, %v806_v37 }
 0x201   : > { %v816_v41 = vld [vmem:[#allocation7 + $0x7] sm:$0xff]  ;;  %v813_v43 = vmul.f32 %v2200_v34, %v811_v38 }
 0x202   : > { %v809_v42 = vadd.f32 %v2198_v33, %v808_v39  ;;  %v818_v46 = vmul.f32 %v2201_v40, %v816_v41 }
 0x204   : > { %v814_v45 = vadd.f32 %v813_v43, %v809_v42 }
 0x206   : > { %v819_v47 = vadd.f32 %v818_v46, %v814_v45 }
 0x208   : > { %v824_v49 = vadd.f32 %v823_v48, %v819_v47 }
 0x20a   : > { %v825_v50 = vsub.f32 0.0, %v824_v49 }
 0x20c   : > { %v826_v51 = vmul.f32 1.442695, %v825_v50 }
 0x20e   : > { %2206 = vpow2.f32 %v826_v51 }
 0x214   : > { %v2207_v52 = vpop.eup %2206 }
 0x215   : > { %v828_v53 = vadd.f32 1.0, %v2207_v52 }
 0x217   : > { %2208 = vrcp.f32 %v828_v53 }
 0x21d   : > { %v2209_v54 = vpop.eup %2208 }
 0x21e   : > { %v2957_v55 = vmul.f32 %v2209_v54, %v824_v49 }
 0x220   : > { %v831_v56 = vpack.c.bf16 %v2957_v55, %v2957_v55 }
 0x222   : > { %1000 = vmatmul.bf16.vlgmr.msra.gmra.mxu2 %v831_v56  ;;  %1013 = vmatmul.bf16.vlgmr.msra.gmra.mxu3 %v831_v56 }
 0x223   : > { %1026 = vmatmul.bf16.vlgmr.msrb.gmra.mxu0 %v831_v56 }
 0x2a0   : > { %v1027_v57 = vpop.f32.mrf.mxu0 }
 0x2a1   : > { %1049 = vst.msk [vmem:[#allocation5] sm:$0xff] %vm1047_vm6, %v1027_v57 }
 0x2a5   : > { %v1001_v63 = vpop.f32.mrf.mxu2  ;;  %v1014_v0 = vpop.f32.mrf.mxu3 }
 0x2a6   : > { %v1035_v1 = vadd.f32 %v2203_v61, %v1001_v63  ;;  %1048 = vst.msk [vmem:[#allocation4] sm:$0xff] %vm1047_vm6, %v1014_v0 }
 0x2a8   : > { %v1037_v2 = vmin.f32 %v1035_v1, 20.0  ;;  %v1029_v3 = vpop.f32.mrf.mxu0  ;;  %vm1036_vm7 = vcmp.gt.f32.partialorder %v1035_v1, 20.0 }
 0x2aa   : > { %v1038_v4 = vmul.f32 1.442695, %v1037_v2 }
 0x2ac   : > { %2210 = vpow2.f32 %v1038_v4 }
 0x2ad   : > { %v1003_v5 = vpop.f32.mrf.mxu2  ;;  %v1016_v6 = vpop.f32.mrf.mxu3 }
 0x2b2   : > { %v2211_v7 = vpop.eup %2210 }
 0x2b3   : > { %v1040_v8 = vadd.f32 1.0, %v2211_v7 }
 0x2b5   : > { %2212 = vlog2.f32 %v1040_v8 }
 0x2bb   : > { %v2213_v9 = vpop.eup %2212 }
 0x2bc   : > { %v1042_v10 = vmul.f32 0.6931472, %v2213_v9 }
 0x2be   : > { %v1043_v12 = vsel %vm1036_vm7, %v1035_v1, %v1042_v10 }
 0x2bf   : > { %1044 = vst [vmem:[#allocation2] sm:$0xff] %v1043_v12  ;;  %v1045_v13 = vmul.f32 %v1043_v12, %v2957_v55 }
 0x2c1   : > { %1046 = vst [vmem:[#allocation3] sm:$0xff] %v1045_v13 }
 0x2c2 LB: >> { %s2985_s21 = sshll.u32 %s2661_s20, 2  ;;  %s1068_s20 = sadd.s32 1, %s2661_s20   ;;  %s2661_s20 = sphi %s2975_s20, %s1068_s20   ;;  %v2657_v60 = vphi %v1061_v60, %v3167_v60   ;;  %v2653_v62 = vphi %v1062_v62, %v3166_v62  }
 0x2c3   : >> { %s1076_s16 = scalar_lea.vmem [#allocation4], %s2985_s21  ;;  %s2990_s19 = scalar_lea.vmem [#allocation3], %s2985_s21 }
 0x2c4   : >> { %v2214_v14 = vld [vmem:[%s1076_s16] ss:$0 sm:$0xff]  ;;  %v2215_v15 = vld [vmem:[%s1076_s16 + $0x1] ss:$0 sm:$0xff]  ;;  %v2216_v17 = vld [vmem:[%s1076_s16 + $0x2] ss:$0 sm:$0xff] }
 0x2c5   : >> { %v1080_v18 = vmul.f32 %v2214_v14, %v2933_v16  ;;  %v1137_v19 = vmul.f32 %v2215_v15, %v2933_v16  ;;  %v1194_v20 = vmul.f32 %v2216_v17, %v2933_v16  ;;  %s2996_s12 = scalar_lea.vmem [#allocation2], %s2985_s21  ;;  %v1079_v26 = vmul.f32 %v2214_v14, %v2931_v11  ;;  %v2217_v30 = vld [vmem:[%s1076_s16 + $0x3] ss:$0 sm:$0xff]  ;;  %s3027_s18 = scalar_lea.vmem [#allocation5], %s2985_s21 }
 0x2c6   : >> { %v1136_v27 = vmul.f32 %v2215_v15, %v2931_v11  ;;  %v1193_v28 = vmul.f32 %v2216_v17, %v2931_v11  ;;  %v1251_v32 = vmul.f32 %v2217_v30, %v2933_v16  ;;  %v1250_v33 = vmul.f32 %v2217_v30, %v2931_v11  ;;  %v2220_v36 = vld [vmem:[%s2996_s12] ss:$0 sm:$0xff]  ;;  %v2222_v38 = vld [vmem:[%s2996_s12 + $0x1] ss:$0 sm:$0xff]  ;;  %v2223_v41 = vld [vmem:[%s2996_s12 + $0x2] ss:$0 sm:$0xff] }
 0x2c7   : >> { %v1084_v23 = vsel %vm1047_vm6, %v1080_v18, 0.0  ;;  %v1141_v24 = vsel %vm1047_vm6, %v1137_v19, 0.0  ;;  %v1198_v25 = vsel %vm1047_vm6, %v1194_v20, 0.0  ;;  %v1081_v29 = vsel %vm1047_vm6, %v1079_v26, 0.0  ;;  %v2225_v46 = vld [vmem:[%s2996_s12 + $0x3] ss:$0 sm:$0xff] }
 0x2c8   : >> { %1085 = vadd.xlane.f32.xlu0 %v1084_v23  ;;  %1142 = vadd.xlane.f32.xlu1 %v1141_v24  ;;  %v1138_v31 = vsel %vm1047_vm6, %v1136_v27, 0.0  ;;  %v1195_v21 = vsel %vm1047_vm6, %v1193_v28, 0.0  ;;  %v1255_v34 = vsel %vm1047_vm6, %v1251_v32, 0.0  ;;  %v1252_v35 = vsel %vm1047_vm6, %v1250_v33, 0.0  ;;  %v2218_v50 = vld [vmem:[%s2990_s19] ss:$0 sm:$0xff] }
 0x2c9   : >> { %1199 = vadd.xlane.f32.xlu2 %v1198_v25  ;;  %v1089_v37 = vmul.f32 %v2220_v36, %v2964_v59  ;;  %v1146_v40 = vmul.f32 %v2222_v38, %v2964_v59  ;;  %v1088_v42 = vmul.f32 %v2220_v36, %v2962_v58  ;;  %v1203_v44 = vmul.f32 %v2223_v41, %v2964_v59  ;;  %v2219_v51 = vld [vmem:[%s2990_s19 + $0x1] ss:$0 sm:$0xff]  ;;  %v2221_v4 = vld [vmem:[%s2990_s19 + $0x2] ss:$0 sm:$0xff]  ;;  %v1102_v26 = vld [vmem:[%s3027_s18] sm:$0x1] }
 0x2ca   : >> { %v1145_v49 = vmul.f32 %v2222_v38, %v2962_v58  ;;  %v1260_v53 = vmul.f32 %v2225_v46, %v2964_v59  ;;  %v1202_v57 = vmul.f32 %v2223_v41, %v2962_v58  ;;  %v2224_v28 = vld [vmem:[%s2990_s19 + $0x3] ss:$0 sm:$0xff]  ;;  %v1901_v32 = vld [vmem:[%s3027_s18 + $0x1] sm:$0x1]  ;;  %s1126_s6 = scalar_lea.vmem [#allocation6], %s2985_s21  ;;  %p1065_p1 = scmp.ge.s32.totalorder %s1068_s20, 2  }
 0x2cb   : >> { %v1092_v39 = vmul.f32 1.442695, %v1089_v37  ;;  %v1149_v43 = vmul.f32 1.442695, %v1146_v40  ;;  %v1090_v45 = vmul.f32 1.442695, %v1088_v42 }
 0x2cc   : >> { %v1206_v48 = vmul.f32 1.442695, %v1203_v44  ;;  %v1147_v56 = vmul.f32 1.442695, %v1145_v49  ;;  %v1263_v5 = vmul.f32 1.442695, %v1260_v53 }
 0x2cd   : >> { %2226 = vpow2.f32 %v1092_v39  ;;  %v1204_v7 = vmul.f32 1.442695, %v1202_v57  ;;  %v1912_v42 = vld [vmem:[%s3027_s18 + $0x2] sm:$0x1]  ;;  %s3168_s17 = sld [smem:[#allocation47_spill]] (%p1065_p1)  ;;  %v2010_v11 = vld [vmem:[#allocation22 + $0x18] sm:$0xff] (%p1065_p1) }
 0x2ce   : >> { %2228 = vpow2.f32 %v1149_v43  ;;  %v2011_v57 = vld [vmem:[#allocation22 + $0x20] sm:$0xff] (%p1065_p1)  ;;  %s3169_s4 = sld [smem:[#allocation35_spill]] (%p1065_p1)  ;;  %s1430_s16 = sshll.u32 (%p1065_p1), %s626_s8, 4  ;;  %s1431_s16 = int_to_ptr.vmem [resolvable:$true] %s1430_s16 }
 0x2cf   : >> { %2230 = vpow2.f32 %v1090_v45  ;;  %v1923_v45 = vld [vmem:[%s3027_s18 + $0x3] sm:$0x1]  ;;  %s3170_s20 = sld [smem:[#allocation50_spill]] (%p1065_p1)  ;;  %s1400_s12 = scalar_lea.sflag (%p1065_p1), [#allocation26], %s2893_s13 }
 0x2d0   : >> { %1082 = vadd.xlane.f32.xlu0 %v1081_v29  ;;  %1139 = vadd.xlane.f32.xlu1 %v1138_v31  ;;  %2232 = vpow2.f32 %v1206_v48 }
 0x2d1   : >> { %1196 = vadd.xlane.f32.xlu2 %v1195_v21  ;;  %2234 = vpow2.f32 %v1147_v56 }
 0x2d2   : >> { %2236 = vpow2.f32 %v1263_v5  ;;  %v2007_v5 = vld [vmem:[#allocation22] sm:$0xff] (%p1065_p1) }
 0x2d3   : >> { %v2227_v47 = vpop.eup %2226  ;;  %2238 = vpow2.f32 %v1204_v7 }
 0x2d4   : >> { %v1095_v52 = vmul.f32 %v2653_v62, %v2227_v47  ;;  %v2229_v0 = vpop.eup %2228  ;;  %v1259_v62 = vmul.f32 %v2225_v46, %v2962_v58  ;;  %v2009_v58 = vld [vmem:[#allocation22 + $0x10] sm:$0xff] (%p1065_p1)  ;;  %s1961_s9 = sshll.u32 (%p1065_p1), %s3169_s4, 1 }
 0x2d5   : >> { %v2231_v6 = vpop.eup %2230  ;;  %s1410_s10 = sadd.s32 (%p1065_p1), %s2633_s28, %s1961_s9  ;;  %s2507_s22 = scalar_lea.hbm (%p1065_p1), %s3170_s20, 32 }
 0x2d6   : >> { %v2233_v9 = vpop.eup %2232  ;;  %v1094_v13 = vmul.f32 %v2657_v60, %v2231_v6  ;;  %v1261_v15 = vmul.f32 1.442695, %v1259_v62  ;;  %s1962_s11 = sshll.u32 (%p1065_p1), %s1410_s10, 3 }
 0x2d7   : >> { %v2235_v20 = vpop.eup %2234  ;;  %s1428_s21 = scalar_lea.hbm (%p1065_p1), %s3170_s20, %s1962_s11 }
 0x2d8   : >> { %1256 = vadd.xlane.f32.xlu0 %v1255_v34  ;;  %1253 = vadd.xlane.f32.xlu1 %v1252_v35  ;;  %2240 = vpow2.f32 %v1261_v15  ;;  %v2237_v60 = vpop.eup %2236  ;;  %s1432_s19 = sshll.u32 (%p1065_p1), %s1428_s21, 4  ;;  %s1433_s19 = int_to_ptr.hbm [resolvable:$true] %s1432_s19 }
 0x2d9   : >> { %v2239_v30 = vpop.eup %2238  ;;  %s2501_s18 = sshra.s32 (%p1065_p1), %s1433_s19, 4  ;;  %s2502_s18 = int_to_ptr.hbm [resolvable:$true] %s2501_s18 }
 0x2da   : > { %p2508_p11 = scmp.lt.s32.totalorder (%p1065_p1), %s2502_s18, %s3170_s20 }
 0x2de   : >> { %v2241_v38 = vpop.eup %2240 }
 0x33b   : >> { %v1086_v54 = vpop.xlane.xlu0 %1085  ;;  %v1143_v63 = vpop.xlane.xlu1 %1142 }
 0x33c   : >> { %v1098_v61 = vmul.f32 %v2218_v50, %v1086_v54  ;;  %v1200_v1 = vpop.xlane.xlu2 %1199  ;;  %v1155_v2 = vmul.f32 %v2219_v51, %v1143_v63  ;;  %v2012_v54 = vld [vmem:[#allocation22 + $0x28] sm:$0xff] (%p1065_p1)  ;;  %v2242_v63 = vld [vmem:[%s3168_s17] ss:$0 sm:$0xff] (%p1065_p1) }
 0x33d   : >> { %v1212_v10 = vmul.f32 %v2221_v4, %v1200_v1  ;;  %v1306_v16 = vmul.f32 (%p1065_p1), %v2242_v63, %v2957_v55 }
 0x33e   : >> { %v1100_v3 = vadd.f32 %v1098_v61, %v1095_v52  ;;  %v2013_v52 = vld [vmem:[#allocation22 + $0x30] sm:$0xff] (%p1065_p1) }
 0x340   : >> { %1120 = vmatpush.msra.mxu0 %v1100_v3  ;;  %v1152_v8 = vmul.f32 %v2229_v0, %v1100_v3  ;;  %v2008_v3 = vld [vmem:[#allocation22 + $0x8] sm:$0xff] (%p1065_p1) }
 0x342   : >> { %v1157_v12 = vadd.f32 %v1155_v2, %v1152_v8 }
 0x343   : >> { %v1083_v14 = vpop.xlane.xlu0 %1082  ;;  %v1140_v18 = vpop.xlane.xlu1 %1139 }
 0x344   : >> { %v1097_v17 = vmul.f32 %v2218_v50, %v1083_v14  ;;  %1177 = vmatpush.msra.mxu1 %v1157_v12  ;;  %v1209_v19 = vmul.f32 %v2233_v9, %v1157_v12  ;;  %v1154_v23 = vmul.f32 %v2219_v51, %v1140_v18  ;;  %v1197_v27 = vpop.xlane.xlu2 %1196  ;;  %v2014_v50 = vld [vmem:[#allocation22 + $0x38] sm:$0xff] (%p1065_p1)  ;;  %v1308_v51 = vsub.f32 (%p1065_p1), 0.0, %v2940_v22 }
 0x345   : >> { %v1211_v31 = vmul.f32 %v2221_v4, %v1197_v27 }
 0x346   : >> { %v1099_v24 = vadd.f32 %v1097_v17, %v1094_v13  ;;  %v1214_v25 = vadd.f32 %v1212_v10, %v1209_v19  ;;  %v1309_v53 = vmul.f32 (%p1065_p1), 1.442695, %v1308_v51 }
 0x348   : >> { %1121 = vmatpush.msra.mxu0 %v1099_v24  ;;  %1234 = vmatpush.msra.mxu2 %v1214_v25  ;;  %v1151_v29 = vmul.f32 %v2235_v20, %v1099_v24  ;;  %v1266_v37 = vmul.f32 %v2237_v60, %v1214_v25  ;;  %2243 = vpow2.f32 (%p1065_p1), %v1309_v53 }
 0x349   : >> { %1893 = vmatmul.msk.f32.vlgmr.msra.gmra.mxu0 %vm1047_vm6, %v1102_v26 }
 0x34a   : >> { %v1156_v21 = vadd.f32 %v1154_v23, %v1151_v29  ;;  %1380 = vmatpush.bf16.msra.mxu0 (%p1065_p1), %v2014_v50 }
 0x34b   : >> { %v1257_v33 = vpop.xlane.xlu0 %1256  ;;  %v1254_v35 = vpop.xlane.xlu1 %1253 }
 0x34c   : >> { %v1269_v34 = vmul.f32 %v2224_v28, %v1257_v33  ;;  %1178 = vmatpush.msra.mxu1 %v1156_v21  ;;  %v1208_v36 = vmul.f32 %v2239_v30, %v1156_v21  ;;  %v1268_v39 = vmul.f32 %v2224_v28, %v1254_v35 }
 0x34d   : >> { %1902 = vmatmul.msk.f32.vlgmr.msra.gmra.mxu1 %vm1047_vm6, %v1901_v32 }
 0x34e   : >> { %v1213_v40 = vadd.f32 %v1211_v31, %v1208_v36  ;;  %v1271_v41 = vadd.f32 %v1269_v34, %v1266_v37   ;;  %1381 = vmatpush.bf16.msra.mxu0 (%p1065_p1), %v2013_v52  ;;  %v2244_v56 = vpop.eup (%p1065_p1), %2243 }
 0x34f   : > { %v1311_v61 = vadd.f32 (%p1065_p1), 1.0, %v2244_v56 }
 0x350   : >> { %1235 = vmatpush.msra.mxu2 %v1213_v40  ;;  %1291 = vmatpush.msra.mxu3 %v1271_v41  ;;  %v1265_v43 = vmul.f32 %v2241_v38, %v1213_v40  ;;  %v3166_v62 = vmov %v1271_v41  ;;  %1300 = vst [vmem:[#allocation8 + $0x8] sm:$0xff] (%p1065_p1), %v1271_v41 }
 0x351   : >> { %1913 = vmatmul.msk.f32.vlgmr.msra.gmra.mxu2 %vm1047_vm6, %v1912_v42  ;;  %2245 = vrcp.f32 (%p1065_p1), %v1311_v61 }
 0x352   : >> { %v1270_v44 = vadd.f32 %v1268_v39, %v1265_v43   ;;  %1382 = vmatpush.bf16.msra.mxu0 (%p1065_p1), %v2012_v54 }
 0x354   : >> { %1292 = vmatpush.msra.mxu3 %v1270_v44  ;;  %v3167_v60 = vmov %v1270_v44  ;;  %1299 = vst [vmem:[#allocation8] sm:$0xff] (%p1065_p1), %v1270_v44 }
 0x355   : >> { %1924 = vmatmul.msk.f32.vlgmr.msra.gmra.mxu3 %vm1047_vm6, %v1923_v45 }
 0x356   : > { %1383 = vmatpush.bf16.msra.mxu0 (%p1065_p1), %v2011_v57 }
 0x357   : > { %v2246_v0 = vpop.eup (%p1065_p1), %2245 }
 0x358   : > { %v1313_v2 = vmul.f32 (%p1065_p1), %v2246_v0, %v2940_v22 }
 0x35a   : > { %1384 = vmatpush.bf16.msra.mxu0 (%p1065_p1), %v2010_v11 }
 0x35e   : > { %1385 = vmatpush.bf16.msra.mxu0 (%p1065_p1), %v2009_v58 }
 0x362   : > { %1386 = vmatpush.bf16.msra.mxu0 (%p1065_p1), %v2008_v3 }
 0x366   : > { %1387 = vmatpush.bf16.msra.mxu0 (%p1065_p1), %v2007_v5 }
 0x3c6   : >> { %v1123_v46 = vpop.f32.mrf.mxu0 }
 0x3c7   : >> { %1127 = vst [vmem:[%s1126_s6] sm:$0x1] %v1123_v46 }
 0x3ca   : >> { %v1180_v47 = vpop.f32.mrf.mxu1 }
 0x3cb   : >> { %1904 = vst [vmem:[%s1126_s6 + $0x1] sm:$0x1] %v1180_v47 }
 0x3d4   : >> { %v1237_v48 = vpop.f32.mrf.mxu2 }
 0x3d5   : >> { %1915 = vst [vmem:[%s1126_s6 + $0x2] sm:$0x1] %v1237_v48  ;;  %1067 = sbr.rel (!%p1065_p1) target bundleno = 706 (0x2c2), region = 198 }
 0x3d8   : >> { %v1294_v49 = vpop.f32.mrf.mxu3 }
 0x3d9   : >> { %1926 = vst [vmem:[%s1126_s6 + $0x3] sm:$0x1] %v1294_v49  ;;  %s2503_s6 = scalar_lea.hbm (%p1065_p1), %s2502_s18, 8 }
 0x3da   : > { %p2504_p8 = scmp.ne.s32.totalorder %s2502_s18, %s2503_s6  ;;  %p2509_p12 = scmp.lt.s32.totalorder %s2507_s22, %s2503_s6 }
 0x3dc   : > { %p2505_p9 = pnand %p2504_p8, %p2862_p0  ;;  %p2510_p13 = por %p2509_p12, %p2508_p11 }
 0x3de   : > { %p2506_p10 = pneg %p2505_p9 }
 0x3e0   : > { %v1301_v59 = vld [vmem:[#allocation6] sm:$0xff]  ;;  %p2511_p2 = pnand %p2510_p13, %p2506_p10 }
 0x3e1   : > { %v1307_v1 = vadd.f32 %v1306_v16, %v1301_v59 }
 0x3e3   : > { %v1314_v4 = vmul.f32 %v1313_v2, %v1307_v1 }
 0x3e5   : > { %v1315_v6 = vpack.c.bf16 %v1314_v4, %v1314_v4 }
 0x3e7   : > { %1388 = vmatmul.bf16.vlgmr.msra.gmra.mxu0 %v1315_v6 }
 0x3e8   : > { %2514 = shalt.err (!%p2511_p2)
}
 0x3e9   : > { %2044 = dma.vmem_to_hbm [thread:$0]  (%p2862_p0), %s1431_s16, 128, %s1433_s19, %s1400_s12  }
 0x3ea   : > { %s3171_s10 = sld [smem:[#allocation49_spill]]  ;;  %s1414_s30 = sshll.u32 %s619_s3, 4  ;;  %s1415_s30 = int_to_ptr.vmem [resolvable:$true] %s1414_s30 }
 0x3eb   : > { %s1395_s18 = scalar_lea.sflag [#allocation12], %s2893_s13 }
 0x3f0   : > { %s1412_s14 = scalar_lea.hbm %s3171_s10, %s1962_s11  ;;  %s2535_s11 = scalar_lea.hbm %s3171_s10, 32 }
 0x3f1   : > { %s1416_s21 = sshll.u32 %s1412_s14, 4  ;;  %s1417_s21 = int_to_ptr.hbm [resolvable:$true] %s1416_s21 }
 0x3f2   : > { %s2529_s6 = sshra.s32 %s1417_s21, 4  ;;  %s2530_s6 = int_to_ptr.hbm [resolvable:$true] %s2529_s6 }
 0x3f3   : > { %s2531_s23 = scalar_lea.hbm %s2530_s6, 8  ;;  %p2536_p3 = scmp.lt.s32.totalorder %s2530_s6, %s3171_s10 }
 0x3f4   : > { %p2532_p4 = scmp.ne.s32.totalorder %s2530_s6, %s2531_s23  ;;  %p2537_p1 = scmp.lt.s32.totalorder %s2535_s11, %s2531_s23 }
 0x3f6   : > { %p2533_p5 = pnand %p2532_p4, %p2862_p0  ;;  %p2538_p8 = por %p2537_p1, %p2536_p3 }
 0x3f8   : > { %p2534_p7 = pneg %p2533_p5 }
 0x3fa   : > { %p2539_p9 = pnand %p2538_p8, %p2534_p7 }
 0x464   : > { %v1389_v22 = vpop.f32.mrf.mxu0 }
 0x465   : > { %1393 = vst [vmem:[%s619_s3] sm:$0xff] %v1389_v22 }
 0x466   : > { %2542 = shalt.err (!%p2539_p9)
}
 0x467   : > { %2043 = dma.vmem_to_hbm [thread:$0]  (%p2862_p0), %s1415_s30, 128, %s1417_s21, %s1395_s18  }
 0x46c   : > { %v1391_v55 = vpop.f32.mrf.mxu0 }
 0x46d PF: > { %p2093_p10 = scmp.ge.s32.totalorder %s2649_s15, 2  ;;  %s1444_s13 = sand.u32 1, %s2621_s25  }
 0x46e   : > { %s1445_s7 = scalar_lea.sflag [#allocation12], %s1444_s13 }
 0x46f   : > { %p2074_p11 = pnand %p2093_p10, %p2869_p6 }
 0x471   : > { %p2075_p12 = pneg %p2074_p11 }
 0x473   : > { %2612 = dma.done.wait (%p2075_p12), %s1445_s7, 128  }
 0x474   : > { %2614 = vsyncadd (%p2075_p12), %s1445_s7, 4294967168  ;;  %s1455_s3 = scalar_lea.sflag [#allocation26], %s1444_s13 }
 0x475   : > { %2616 = dma.done.wait (%p2075_p12), %s1455_s3, 128  }
 0x476   : > { %2618 = vsyncadd (%p2075_p12), %s1455_s3, 4294967168  ;;  %s39_s15 = sadd.s32 1, %s2649_s15   ;;  %s3172_s28 = sld [smem:[#allocation36_spill]] }
 0x477   : > { %p36_p13 = scmp.ge.s32.totalorder %s39_s15, 6   ;;  %s3173_s2 = sld [smem:[#allocation37_spill]] }
 0x478   : > { %s3174_s30 = sld [smem:[#allocation38_spill]]  ;;  %s3176_s25 = smov %s2625_s26 }
 0x479   : > { %s3175_s14 = sld [smem:[#allocation39_spill]]  ;;  %s3177_s26 = smov %s2629_s27 }
 0x47a   : > { %s3178_s27 = smov %s2876_s29  ;;  %38 = sbr.rel (!%p36_p13) target bundleno = 26 (0x1a), region = 209 }
 0x47d   : > { %s3179_s29 = smov %s3173_s2 }
 0x47f   :  { %1461 = vsyncpa [#allocation11], 1 }
 0x480   :  { %1463 = vsyncpa [#allocation11 + $0x1], 1 }
 0x481   :  { %1464 = vsyncpa [#allocation14], 1 }
 0x482   :  { %1466 = vsyncpa [#allocation14 + $0x1], 1 }
 0x483   :  { %1467 = vsyncpa [#allocation17], 1 }
 0x484   :  { %1468 = vsyncpa [#allocation20], 1 }
 0x485   :  { %1469 = vsyncpa [#allocation23], 1 }
 0x486   :  { %1470 = vsyncpa [#allocation12], 1 }
 0x487   :  { %1472 = vsyncpa [#allocation12 + $0x1], 1 }
 0x488   :  { %1473 = vsyncpa [#allocation26], 1 }
 0x489   :  { %1475 = vsyncpa [#allocation26 + $0x1], 1 }

</bundles_post_ra>
